<compile_context>
chip_gen: v7x
topology: tpu7x:2x2x1
jax: 0.10.0
libtpu: 0.0.40
codegen_flags: <defaults>
</compile_context>

<pallas_src>
import jax
import jax.numpy as jnp
from jax.experimental import pallas as pl
from jax.experimental.pallas import tpu as pltpu

EPS = 1e-5


# ------------------------ pass 1: conv on one row slab ------------------------
def _conv_tile_kernel(x_ref, w_ref, y_ref, s_ref, q_ref):
    """3x3 conv (stride 1) on one (batch, row-tile) slab + partial BN stats.

    x_ref : (1, TH+2, W, 3*Cin) bf16  dx-folded, zero-padded input slab (halo rows incl.)
    w_ref : (3, 3*Cin, Cout)    bf16  per-dy weight, K ordered (dx, cin)
    y_ref : (1, TH*W, Cout)     bf16  conv output tile (bias dropped: BN cancels it)
    s_ref : (1, 1, Cout)        f32   per-tile sum       (combined outside for BN)
    q_ref : (1, 1, Cout)        f32   per-tile sum-of-sq (combined outside for BN)
    """
    xs = x_ref[0]                       # (TH+2, W, 3*Cin)
    th2, wdim, k3 = xs.shape
    th = th2 - 2
    p = th * wdim

    acc = None
    for dy in range(3):
        # leading-dim slice + sublane-aligned reshape (W % 8 == 0): no relayout copy.
        op = xs[dy:dy + th].reshape(p, k3)
        t = jnp.dot(op, w_ref[dy], preferred_element_type=jnp.float32)
        acc = t if acc is None else acc + t

    y_ref[0] = acc.astype(y_ref.dtype)
    # one-pass stats in f32 from the f32 accumulator (var = E[x^2] - mean^2 outside).
    s_ref[0] = jnp.sum(acc, axis=0, keepdims=True)
    q_ref[0] = jnp.sum(acc * acc, axis=0, keepdims=True)


# ---------------------- pass 2: BN(train) affine + ReLU -----------------------
def _bn_relu_kernel(y_ref, scale_ref, shift_ref, o_ref):
    """Elementwise y*scale + shift then ReLU, on a lane-dense (rows, W*Cout) view."""
    y = y_ref[...].astype(jnp.float32) * scale_ref[...] + shift_ref[...]
    o_ref[...] = jnp.maximum(y, 0.0).astype(o_ref.dtype)


# ------------------------------ wrapper helpers -------------------------------
def _fold_dx_and_slab(x_nhwc, th):
    """Zero-pad H/W by 1, fold the 3 dx taps into channels, cut overlapping row slabs.

    (N, H, W, Cin) -> (N*HT, TH+2, W, 3*Cin) bf16
    Layout plumbing done once in the wrapper so the kernel never materializes
    strided shifted windows.
    """
    n, h, w, cin = x_nhwc.shape
    ht = h // th
    xpad = jnp.pad(x_nhwc, ((0, 0), (1, 1), (1, 1), (0, 0))).astype(jnp.bfloat16)
    # xcols[n, hp, w, dx*Cin + c] = xpad[n, hp, w + dx, c]
    xcols = jnp.concatenate([xpad[:, :, dx:dx + w, :] for dx in range(3)], axis=-1)
    # overlapping row slabs (1-row halo each side) -> plain Blocked specs, no halo DMA.
    slabs = jnp.stack([xcols[:, r * th:r * th + th + 2] for r in range(ht)], axis=1)
    return slabs.reshape(n * ht, th + 2, w, 3 * cin)


def _weight_to_dy_taps(w_oihw):
    """(Cout, Cin, 3, 3) torch layout -> (3, 3*Cin, Cout) bf16, K ordered (dx, cin)."""
    cout, cin = w_oihw.shape[0], w_oihw.shape[1]
    w = jnp.transpose(w_oihw, (2, 3, 1, 0))          # (dy, dx, cin, cout)
    return w.reshape(3, 3 * cin, cout).astype(jnp.bfloat16)


def _pick_row_tile(rows, itemsizes, cap=512):
    """Largest row tile <= cap that divides `rows` and is a multiple of the
    sublane pack of every dtype touched (8 for f32, 16 for bf16)."""
    sub = max(8 * (4 // int(it)) for it in itemsizes)
    if rows <= cap and rows % sub == 0:
        return rows
    tr = cap - cap % sub
    while tr >= sub:
        if rows % tr == 0:
            return tr
        tr -= sub
    return rows                                       # full extent is always legal


def _conv_bn_relu_stage(x_nhwc, w_oihw, gamma, beta, *, row_tile=8,
                        out_dtype=jnp.float32):
    """One Conv3x3 -> BatchNorm2d(train) -> ReLU stage. Returns (N, H, W, Cout)."""
    n, h, w, cin = x_nhwc.shape
    cout = w_oihw.shape[0]

    # row_tile: biggest slab that comfortably fits double-buffered in scoped VMEM;
    # at these toy shapes any value works.
    th = row_tile if h % row_tile == 0 else h
    ht = h // th
    nt = n * ht
    p = th * w

    assert w % 8 == 0, "W must be a multiple of 8 (sublane-aligned row tiles)"
    assert (w * cout) % 128 == 0, "pass-2 lane-dense view needs (W*Cout) % 128 == 0"
    # TODO(synk): general fallback for non-128-aligned W*Cout / ragged H not implemented.

    xslabs = _fold_dx_and_slab(x_nhwc, th)           # (NT, TH+2, W, 3*Cin) bf16
    wdy = _weight_to_dy_taps(w_oihw)                 # (3, 3*Cin, Cout)     bf16

    # ---- pass 1: conv + per-tile partial stats, grid over batch x row tiles ----
    y, s, q = pl.pallas_call(
        _conv_tile_kernel,
        out_shape=(jax.ShapeDtypeStruct((nt, p, cout), jnp.bfloat16),
                   jax.ShapeDtypeStruct((nt, 1, cout), jnp.float32),
                   jax.ShapeDtypeStruct((nt, 1, cout), jnp.float32)),
        grid=(nt,),
        in_specs=[pl.BlockSpec((1, th + 2, w, 3 * cin), lambda i: (i, 0, 0, 0)),
                  pl.BlockSpec((3, 3 * cin, cout), lambda i: (0, 0, 0))],
        out_specs=(pl.BlockSpec((1, p, cout), lambda i: (i, 0, 0)),
                   pl.BlockSpec((1, 1, cout), lambda i: (i, 0, 0)),
                   pl.BlockSpec((1, 1, cout), lambda i: (i, 0, 0))),
        compiler_params=pltpu.CompilerParams(
            dimension_semantics=("parallel",)),
    )(xslabs, wdy)

    # ---- combine partial stats (tiny per-channel vectors, plain JAX) ----
    cnt = jnp.float32(n * h * w)
    mean = jnp.sum(s, axis=(0, 1)) / cnt
    var = jnp.maximum(jnp.sum(q, axis=(0, 1)) / cnt - mean * mean, 0.0)
    scale = gamma * jax.lax.rsqrt(var + EPS)          # gamma folded into inv_std
    shift = beta - mean * scale                       # conv bias cancelled by train-BN

    # ---- pass 2: normalize + ReLU on a lane-dense (N*H, W*Cout) view ----
    rows = n * h
    lanes = w * cout
    tr = _pick_row_tile(rows, (jnp.dtype(jnp.bfloat16).itemsize,
                               jnp.dtype(out_dtype).itemsize))
    yl = y.reshape(rows, lanes)                       # contiguous regroup: free reshape
    scale_t = jnp.tile(scale, w).reshape(1, lanes)    # per-channel pattern tiled over W
    shift_t = jnp.tile(shift, w).reshape(1, lanes)

    out = pl.pallas_call(
        _bn_relu_kernel,
        out_shape=jax.ShapeDtypeStruct((rows, lanes), out_dtype),
        grid=(rows // tr,),
        in_specs=[pl.BlockSpec((tr, lanes), lambda i: (i, 0)),
                  pl.BlockSpec((1, lanes), lambda i: (0, 0)),
                  pl.BlockSpec((1, lanes), lambda i: (0, 0))],
        out_specs=pl.BlockSpec((tr, lanes), lambda i: (i, 0)),
        compiler_params=pltpu.CompilerParams(
            dimension_semantics=("parallel",)),
    )(yl, scale_t, shift_t)

    return out.reshape(n, h, w, cout)


@jax.jit
def conv_block_forward(x_nchw, params):
    """Full conv_block forward. Input/output are NCHW like PyTorch."""
    x = jnp.transpose(x_nchw, (0, 2, 3, 1))           # NCHW -> NHWC
    # Conv biases b1/b2 exist in params but are exact no-ops under training-mode
    # BatchNorm (mean subtraction cancels them), so they are not sent to the kernel.
    # Stage-1 activations feed a bf16 matmul anyway -> keep them bf16 end to end.
    x = _conv_bn_relu_stage(x, params["w1"], params["gamma1"], params["beta1"],
                            out_dtype=jnp.bfloat16)
    x = _conv_bn_relu_stage(x, params["w2"], params["gamma2"], params["beta2"],
                            out_dtype=jnp.float32)
    return jnp.transpose(x, (0, 3, 1, 2))             # NHWC -> NCHW


# ----------------------------- reference (pure JAX) -----------------------------
def _ref_stage(x_nchw, w_oihw, b, gamma, beta):
    y = jax.lax.conv_general_dilated(
        x_nchw, w_oihw, window_strides=(1, 1), padding=((1, 1), (1, 1)),
        dimension_numbers=("NCHW", "OIHW", "NCHW"))
    y = y + b[None, :, None, None]
    mean = jnp.mean(y, axis=(0, 2, 3), keepdims=True)
    var = jnp.mean((y - mean) ** 2, axis=(0, 2, 3), keepdims=True)
    y = (y - mean) * jax.lax.rsqrt(var + EPS)
    y = y * gamma[None, :, None, None] + beta[None, :, None, None]
    return jnp.maximum(y, 0.0)


def conv_block_reference(x_nchw, params):
    x = _ref_stage(x_nchw, params["w1"], params["b1"], params["gamma1"], params["beta1"])
    x = _ref_stage(x, params["w2"], params["b2"], params["gamma2"], params["beta2"])
    return x


# ------------------------------------ main ------------------------------------
def _init_params(key, ch_in, ch_out):
    """Deterministic init mirroring nn.Conv2d / nn.BatchNorm2d defaults."""
    ks = jax.random.split(key, 4)
    fan1 = ch_in * 3 * 3
    fan2 = ch_out * 3 * 3
    k1 = 1.0 / jnp.sqrt(fan1)
    k2 = 1.0 / jnp.sqrt(fan2)
    return {
        "w1": jax.random.uniform(ks[0], (ch_out, ch_in, 3, 3), jnp.float32, -k1, k1),
        "b1": jax.random.uniform(ks[1], (ch_out,), jnp.float32, -k1, k1),
        "gamma1": jnp.ones((ch_out,), jnp.float32),
        "beta1": jnp.zeros((ch_out,), jnp.float32),
        "w2": jax.random.uniform(ks[2], (ch_out, ch_out, 3, 3), jnp.float32, -k2, k2),
        "b2": jax.random.uniform(ks[3], (ch_out,), jnp.float32, -k2, k2),
        "gamma2": jnp.ones((ch_out,), jnp.float32),
        "beta2": jnp.zeros((ch_out,), jnp.float32),
    }
    # TODO(synk): BatchNorm running_mean/running_var buffer updates (a training
    # side effect that does not affect the forward output) are not reproduced.


if __name__ == "__main__":
    key = jax.random.PRNGKey(0)
    kx, kp = jax.random.split(key)

    N, CH_IN, CH_OUT, HW = 2, 4, 8, 16
    x = jax.random.normal(kx, (N, CH_IN, HW, HW), jnp.float32)  # NCHW
    params = _init_params(kp, CH_IN, CH_OUT)

    out = conv_block_forward(x, params)
    out = jax.block_until_ready(out)

    ref = conv_block_reference(x, params)
    assert out.shape == (N, CH_OUT, HW, HW), out.shape
    # Tolerance accounts for bf16 MXU operands / bf16 intermediates (f32
    # accumulation and BN math); logic errors would be O(0.5+).
    rel_err = float(jnp.max(jnp.abs(out - ref) / (1.0 + jnp.abs(ref))))
    assert rel_err < 8e-2, f"mismatch vs reference: {rel_err}"

    print("KERNEL_OK")
</pallas_src>

<mosaic_0001>
module attributes {stable_mosaic.version = 11 : i64} {
  func.func @_conv_tile_kernel(%arg0: i32, %arg1: memref<1x10x16x12xbf16, #tpu.memory_space<vmem>>, %arg2: memref<3x12x8xbf16, #tpu.memory_space<vmem>>, %arg3: memref<1x128x8xbf16, #tpu.memory_space<vmem>>, %arg4: memref<1x1x8xf32, #tpu.memory_space<vmem>>, %arg5: memref<1x1x8xf32, #tpu.memory_space<vmem>>) attributes {dimension_semantics = [#tpu.dimension_semantics<parallel>], iteration_bounds = array<i64: 4>, scalar_prefetch = 0 : i64, scratch_operands = 0 : i64, tpu.core_type = #tpu.core_type<tc>, window_params = [{transform_indices = @transform_0, window_bounds = array<i64: 1, 10, 16, 12>}, {pipeline_mode = #tpu.pipeline_mode<synchronous>, transform_indices = @transform_1, window_bounds = array<i64: 3, 12, 8>}, {transform_indices = @transform_2, window_bounds = array<i64: 1, 128, 8>}, {transform_indices = @transform_3, window_bounds = array<i64: 1, 1, 8>}, {transform_indices = @transform_4, window_bounds = array<i64: 1, 1, 8>}]} {
    %c0 = arith.constant 0 : index
    %c0_0 = arith.constant 0 : index
    %c0_1 = arith.constant 0 : index
    %c0_2 = arith.constant 0 : index
    %0 = vector.load %arg1[%c0, %c0_0, %c0_1, %c0_2] : memref<1x10x16x12xbf16, #tpu.memory_space<vmem>>, vector<1x10x16x12xbf16>
    %1 = vector.shape_cast %0 : vector<1x10x16x12xbf16> to vector<10x16x12xbf16>
    %2 = vector.extract_strided_slice %1 {offsets = [0, 0, 0], sizes = [8, 16, 12], strides = [1, 1, 1]} : vector<10x16x12xbf16> to vector<8x16x12xbf16>
    %3 = vector.shape_cast %2 : vector<8x16x12xbf16> to vector<128x12xbf16>
    %c0_3 = arith.constant 0 : index
    %c0_4 = arith.constant 0 : index
    %c0_5 = arith.constant 0 : index
    %4 = vector.load %arg2[%c0_3, %c0_4, %c0_5] : memref<3x12x8xbf16, #tpu.memory_space<vmem>>, vector<1x12x8xbf16>
    %5 = vector.shape_cast %4 : vector<1x12x8xbf16> to vector<12x8xbf16>
    %cst = arith.constant dense<0.000000e+00> : vector<128x8xf32>
    %6 = tpu.matmul %3, %5, %cst {dimension_numbers = #tpu.dot_dimension_numbers<[1], [0], [0], [1], [0, 0, 1, 1], [], []>} : vector<128x12xbf16>, vector<12x8xbf16>, vector<128x8xf32> -> vector<128x8xf32>
    %7 = vector.extract_strided_slice %1 {offsets = [1, 0, 0], sizes = [8, 16, 12], strides = [1, 1, 1]} : vector<10x16x12xbf16> to vector<8x16x12xbf16>
    %8 = vector.shape_cast %7 : vector<8x16x12xbf16> to vector<128x12xbf16>
    %c1 = arith.constant 1 : index
    %c0_6 = arith.constant 0 : index
    %c0_7 = arith.constant 0 : index
    %9 = vector.load %arg2[%c1, %c0_6, %c0_7] : memref<3x12x8xbf16, #tpu.memory_space<vmem>>, vector<1x12x8xbf16>
    %10 = vector.shape_cast %9 : vector<1x12x8xbf16> to vector<12x8xbf16>
    %cst_8 = arith.constant dense<0.000000e+00> : vector<128x8xf32>
    %11 = tpu.matmul %8, %10, %cst_8 {dimension_numbers = #tpu.dot_dimension_numbers<[1], [0], [0], [1], [0, 0, 1, 1], [], []>} : vector<128x12xbf16>, vector<12x8xbf16>, vector<128x8xf32> -> vector<128x8xf32>
    %12 = arith.addf %6, %11 : vector<128x8xf32>
    %13 = vector.extract_strided_slice %1 {offsets = [2, 0, 0], sizes = [8, 16, 12], strides = [1, 1, 1]} : vector<10x16x12xbf16> to vector<8x16x12xbf16>
    %14 = vector.shape_cast %13 : vector<8x16x12xbf16> to vector<128x12xbf16>
    %c2 = arith.constant 2 : index
    %c0_9 = arith.constant 0 : index
    %c0_10 = arith.constant 0 : index
    %15 = vector.load %arg2[%c2, %c0_9, %c0_10] : memref<3x12x8xbf16, #tpu.memory_space<vmem>>, vector<1x12x8xbf16>
    %16 = vector.shape_cast %15 : vector<1x12x8xbf16> to vector<12x8xbf16>
    %cst_11 = arith.constant dense<0.000000e+00> : vector<128x8xf32>
    %17 = tpu.matmul %14, %16, %cst_11 {dimension_numbers = #tpu.dot_dimension_numbers<[1], [0], [0], [1], [0, 0, 1, 1], [], []>} : vector<128x12xbf16>, vector<12x8xbf16>, vector<128x8xf32> -> vector<128x8xf32>
    %18 = arith.addf %12, %17 : vector<128x8xf32>
    %19 = arith.truncf %18 : vector<128x8xf32> to vector<128x8xbf16>
    %c0_12 = arith.constant 0 : index
    %c0_13 = arith.constant 0 : index
    %c0_14 = arith.constant 0 : index
    %20 = vector.load %arg3[%c0_12, %c0_13, %c0_14] : memref<1x128x8xbf16, #tpu.memory_space<vmem>>, vector<1x128x8xbf16>
    %21 = vector.shape_cast %20 : vector<1x128x8xbf16> to vector<128x8xbf16>
    %22 = vector.shape_cast %19 : vector<128x8xbf16> to vector<1x128x8xbf16>
    tpu.vector_store %arg3[%c0_12, %c0_13, %c0_14], %22 {strides = array<i32>} : memref<1x128x8xbf16, #tpu.memory_space<vmem>>, vector<1x128x8xbf16>,
    %cst_15 = arith.constant dense<0.000000e+00> : vector<8xf32>
    %23 = vector.multi_reduction <add>, %18, %cst_15 [0] : vector<128x8xf32> to vector<8xf32>
    %24 = vector.shape_cast %23 : vector<8xf32> to vector<1x8xf32>
    %c0_16 = arith.constant 0 : index
    %c0_17 = arith.constant 0 : index
    %c0_18 = arith.constant 0 : index
    %25 = vector.load %arg4[%c0_16, %c0_17, %c0_18] : memref<1x1x8xf32, #tpu.memory_space<vmem>>, vector<1x1x8xf32>
    %26 = vector.shape_cast %25 : vector<1x1x8xf32> to vector<1x8xf32>
    %27 = vector.shape_cast %24 : vector<1x8xf32> to vector<1x1x8xf32>
    tpu.vector_store %arg4[%c0_16, %c0_17, %c0_18], %27 {strides = array<i32>} : memref<1x1x8xf32, #tpu.memory_space<vmem>>, vector<1x1x8xf32>,
    %28 = arith.mulf %18, %18 : vector<128x8xf32>
    %cst_19 = arith.constant dense<0.000000e+00> : vector<8xf32>
    %29 = vector.multi_reduction <add>, %28, %cst_19 [0] : vector<128x8xf32> to vector<8xf32>
    %30 = vector.shape_cast %29 : vector<8xf32> to vector<1x8xf32>
    %c0_20 = arith.constant 0 : index
    %c0_21 = arith.constant 0 : index
    %c0_22 = arith.constant 0 : index
    %31 = vector.load %arg5[%c0_20, %c0_21, %c0_22] : memref<1x1x8xf32, #tpu.memory_space<vmem>>, vector<1x1x8xf32>
    %32 = vector.shape_cast %31 : vector<1x1x8xf32> to vector<1x8xf32>
    %33 = vector.shape_cast %30 : vector<1x8xf32> to vector<1x1x8xf32>
    tpu.vector_store %arg5[%c0_20, %c0_21, %c0_22], %33 {strides = array<i32>} : memref<1x1x8xf32, #tpu.memory_space<vmem>>, vector<1x1x8xf32>,
    return
  }
  func.func @transform_0(%arg0: i32) -> (i32, i32, i32, i32) {
    %c0_i32 = arith.constant 0 : i32
    %c0_i32_0 = arith.constant 0 : i32
    %c0_i32_1 = arith.constant 0 : i32
    %c0_i32_2 = arith.constant 0 : i32
    return %arg0, %c0_i32, %c0_i32_0, %c0_i32_1 : i32, i32, i32, i32
  }
  func.func @transform_1(%arg0: i32) -> (i32, i32, i32) {
    %c0_i32 = arith.constant 0 : i32
    %c0_i32_0 = arith.constant 0 : i32
    %c0_i32_1 = arith.constant 0 : i32
    %c0_i32_2 = arith.constant 0 : i32
    return %c0_i32, %c0_i32_0, %c0_i32_1 : i32, i32, i32
  }
  func.func @transform_2(%arg0: i32) -> (i32, i32, i32) {
    %c0_i32 = arith.constant 0 : i32
    %c0_i32_0 = arith.constant 0 : i32
    %c0_i32_1 = arith.constant 0 : i32
    return %arg0, %c0_i32, %c0_i32_0 : i32, i32, i32
  }
  func.func @transform_3(%arg0: i32) -> (i32, i32, i32) {
    %c0_i32 = arith.constant 0 : i32
    %c0_i32_0 = arith.constant 0 : i32
    %c0_i32_1 = arith.constant 0 : i32
    return %arg0, %c0_i32, %c0_i32_0 : i32, i32, i32
  }
  func.func @transform_4(%arg0: i32) -> (i32, i32, i32) {
    %c0_i32 = arith.constant 0 : i32
    %c0_i32_0 = arith.constant 0 : i32
    %c0_i32_1 = arith.constant 0 : i32
    return %arg0, %c0_i32, %c0_i32_0 : i32, i32, i32
  }
}

module attributes {stable_mosaic.version = 11 : i64} {
  func.func @_bn_relu_kernel(%arg0: i32, %arg1: memref<32x128xbf16, #tpu.memory_space<vmem>>, %arg2: memref<1x128xf32, #tpu.memory_space<vmem>>, %arg3: memref<1x128xf32, #tpu.memory_space<vmem>>, %arg4: memref<32x128xbf16, #tpu.memory_space<vmem>>) attributes {dimension_semantics = [#tpu.dimension_semantics<parallel>], iteration_bounds = array<i64: 1>, scalar_prefetch = 0 : i64, scratch_operands = 0 : i64, tpu.core_type = #tpu.core_type<tc>, window_params = [{transform_indices = @transform_0, window_bounds = array<i64: 32, 128>}, {pipeline_mode = #tpu.pipeline_mode<synchronous>, transform_indices = @transform_1, window_bounds = array<i64: 1, 128>}, {pipeline_mode = #tpu.pipeline_mode<synchronous>, transform_indices = @transform_2, window_bounds = array<i64: 1, 128>}, {transform_indices = @transform_3, window_bounds = array<i64: 32, 128>}]} {
    %c0 = arith.constant 0 : index
    %c0_0 = arith.constant 0 : index
    %0 = vector.load %arg1[%c0, %c0_0] : memref<32x128xbf16, #tpu.memory_space<vmem>>, vector<32x128xbf16>
    %1 = arith.extf %0 : vector<32x128xbf16> to vector<32x128xf32>
    %c0_1 = arith.constant 0 : index
    %c0_2 = arith.constant 0 : index
    %2 = vector.load %arg2[%c0_1, %c0_2] : memref<1x128xf32, #tpu.memory_space<vmem>>, vector<1x128xf32>
    %3 = vector.broadcast %2 : vector<1x128xf32> to vector<32x128xf32>
    %4 = arith.mulf %1, %3 : vector<32x128xf32>
    %c0_3 = arith.constant 0 : index
    %c0_4 = arith.constant 0 : index
    %5 = vector.load %arg3[%c0_3, %c0_4] : memref<1x128xf32, #tpu.memory_space<vmem>>, vector<1x128xf32>
    %6 = vector.broadcast %5 : vector<1x128xf32> to vector<32x128xf32>
    %7 = arith.addf %4, %6 : vector<32x128xf32>
    %cst = arith.constant 0.000000e+00 : f32
    %8 = vector.broadcast %cst : f32 to vector<32x128xf32>
    %9 = arith.maximumf %7, %8 : vector<32x128xf32>
    %10 = arith.truncf %9 : vector<32x128xf32> to vector<32x128xbf16>
    %c0_5 = arith.constant 0 : index
    %c0_6 = arith.constant 0 : index
    %11 = vector.load %arg4[%c0_5, %c0_6] : memref<32x128xbf16, #tpu.memory_space<vmem>>, vector<32x128xbf16>
    tpu.vector_store %arg4[%c0_5, %c0_6], %10 {strides = array<i32>} : memref<32x128xbf16, #tpu.memory_space<vmem>>, vector<32x128xbf16>,
    return
  }
  func.func @transform_0(%arg0: i32) -> (i32, i32) {
    %c0_i32 = arith.constant 0 : i32
    %c0_i32_0 = arith.constant 0 : i32
    return %arg0, %c0_i32 : i32, i32
  }
  func.func @transform_1(%arg0: i32) -> (i32, i32) {
    %c0_i32 = arith.constant 0 : i32
    %c0_i32_0 = arith.constant 0 : i32
    %c0_i32_1 = arith.constant 0 : i32
    return %c0_i32, %c0_i32_0 : i32, i32
  }
  func.func @transform_2(%arg0: i32) -> (i32, i32) {
    %c0_i32 = arith.constant 0 : i32
    %c0_i32_0 = arith.constant 0 : i32
    %c0_i32_1 = arith.constant 0 : i32
    return %c0_i32, %c0_i32_0 : i32, i32
  }
  func.func @transform_3(%arg0: i32) -> (i32, i32) {
    %c0_i32 = arith.constant 0 : i32
    %c0_i32_0 = arith.constant 0 : i32
    return %arg0, %c0_i32 : i32, i32
  }
}

module attributes {stable_mosaic.version = 11 : i64} {
  func.func @_conv_tile_kernel(%arg0: i32, %arg1: memref<1x10x16x24xbf16, #tpu.memory_space<vmem>>, %arg2: memref<3x24x8xbf16, #tpu.memory_space<vmem>>, %arg3: memref<1x128x8xbf16, #tpu.memory_space<vmem>>, %arg4: memref<1x1x8xf32, #tpu.memory_space<vmem>>, %arg5: memref<1x1x8xf32, #tpu.memory_space<vmem>>) attributes {dimension_semantics = [#tpu.dimension_semantics<parallel>], iteration_bounds = array<i64: 4>, scalar_prefetch = 0 : i64, scratch_operands = 0 : i64, tpu.core_type = #tpu.core_type<tc>, window_params = [{transform_indices = @transform_0, window_bounds = array<i64: 1, 10, 16, 24>}, {pipeline_mode = #tpu.pipeline_mode<synchronous>, transform_indices = @transform_1, window_bounds = array<i64: 3, 24, 8>}, {transform_indices = @transform_2, window_bounds = array<i64: 1, 128, 8>}, {transform_indices = @transform_3, window_bounds = array<i64: 1, 1, 8>}, {transform_indices = @transform_4, window_bounds = array<i64: 1, 1, 8>}]} {
    %c0 = arith.constant 0 : index
    %c0_0 = arith.constant 0 : index
    %c0_1 = arith.constant 0 : index
    %c0_2 = arith.constant 0 : index
    %0 = vector.load %arg1[%c0, %c0_0, %c0_1, %c0_2] : memref<1x10x16x24xbf16, #tpu.memory_space<vmem>>, vector<1x10x16x24xbf16>
    %1 = vector.shape_cast %0 : vector<1x10x16x24xbf16> to vector<10x16x24xbf16>
    %2 = vector.extract_strided_slice %1 {offsets = [0, 0, 0], sizes = [8, 16, 24], strides = [1, 1, 1]} : vector<10x16x24xbf16> to vector<8x16x24xbf16>
    %3 = vector.shape_cast %2 : vector<8x16x24xbf16> to vector<128x24xbf16>
    %c0_3 = arith.constant 0 : index
    %c0_4 = arith.constant 0 : index
    %c0_5 = arith.constant 0 : index
    %4 = vector.load %arg2[%c0_3, %c0_4, %c0_5] : memref<3x24x8xbf16, #tpu.memory_space<vmem>>, vector<1x24x8xbf16>
    %5 = vector.shape_cast %4 : vector<1x24x8xbf16> to vector<24x8xbf16>
    %cst = arith.constant dense<0.000000e+00> : vector<128x8xf32>
    %6 = tpu.matmul %3, %5, %cst {dimension_numbers = #tpu.dot_dimension_numbers<[1], [0], [0], [1], [0, 0, 1, 1], [], []>} : vector<128x24xbf16>, vector<24x8xbf16>, vector<128x8xf32> -> vector<128x8xf32>
    %7 = vector.extract_strided_slice %1 {offsets = [1, 0, 0], sizes = [8, 16, 24], strides = [1, 1, 1]} : vector<10x16x24xbf16> to vector<8x16x24xbf16>
    %8 = vector.shape_cast %7 : vector<8x16x24xbf16> to vector<128x24xbf16>
    %c1 = arith.constant 1 : index
    %c0_6 = arith.constant 0 : index
    %c0_7 = arith.constant 0 : index
    %9 = vector.load %arg2[%c1, %c0_6, %c0_7] : memref<3x24x8xbf16, #tpu.memory_space<vmem>>, vector<1x24x8xbf16>
    %10 = vector.shape_cast %9 : vector<1x24x8xbf16> to vector<24x8xbf16>
    %cst_8 = arith.constant dense<0.000000e+00> : vector<128x8xf32>
    %11 = tpu.matmul %8, %10, %cst_8 {dimension_numbers = #tpu.dot_dimension_numbers<[1], [0], [0], [1], [0, 0, 1, 1], [], []>} : vector<128x24xbf16>, vector<24x8xbf16>, vector<128x8xf32> -> vector<128x8xf32>
    %12 = arith.addf %6, %11 : vector<128x8xf32>
    %13 = vector.extract_strided_slice %1 {offsets = [2, 0, 0], sizes = [8, 16, 24], strides = [1, 1, 1]} : vector<10x16x24xbf16> to vector<8x16x24xbf16>
    %14 = vector.shape_cast %13 : vector<8x16x24xbf16> to vector<128x24xbf16>
    %c2 = arith.constant 2 : index
    %c0_9 = arith.constant 0 : index
    %c0_10 = arith.constant 0 : index
    %15 = vector.load %arg2[%c2, %c0_9, %c0_10] : memref<3x24x8xbf16, #tpu.memory_space<vmem>>, vector<1x24x8xbf16>
    %16 = vector.shape_cast %15 : vector<1x24x8xbf16> to vector<24x8xbf16>
    %cst_11 = arith.constant dense<0.000000e+00> : vector<128x8xf32>
    %17 = tpu.matmul %14, %16, %cst_11 {dimension_numbers = #tpu.dot_dimension_numbers<[1], [0], [0], [1], [0, 0, 1, 1], [], []>} : vector<128x24xbf16>, vector<24x8xbf16>, vector<128x8xf32> -> vector<128x8xf32>
    %18 = arith.addf %12, %17 : vector<128x8xf32>
    %19 = arith.truncf %18 : vector<128x8xf32> to vector<128x8xbf16>
    %c0_12 = arith.constant 0 : index
    %c0_13 = arith.constant 0 : index
    %c0_14 = arith.constant 0 : index
    %20 = vector.load %arg3[%c0_12, %c0_13, %c0_14] : memref<1x128x8xbf16, #tpu.memory_space<vmem>>, vector<1x128x8xbf16>
    %21 = vector.shape_cast %20 : vector<1x128x8xbf16> to vector<128x8xbf16>
    %22 = vector.shape_cast %19 : vector<128x8xbf16> to vector<1x128x8xbf16>
    tpu.vector_store %arg3[%c0_12, %c0_13, %c0_14], %22 {strides = array<i32>} : memref<1x128x8xbf16, #tpu.memory_space<vmem>>, vector<1x128x8xbf16>,
    %cst_15 = arith.constant dense<0.000000e+00> : vector<8xf32>
    %23 = vector.multi_reduction <add>, %18, %cst_15 [0] : vector<128x8xf32> to vector<8xf32>
    %24 = vector.shape_cast %23 : vector<8xf32> to vector<1x8xf32>
    %c0_16 = arith.constant 0 : index
    %c0_17 = arith.constant 0 : index
    %c0_18 = arith.constant 0 : index
    %25 = vector.load %arg4[%c0_16, %c0_17, %c0_18] : memref<1x1x8xf32, #tpu.memory_space<vmem>>, vector<1x1x8xf32>
    %26 = vector.shape_cast %25 : vector<1x1x8xf32> to vector<1x8xf32>
    %27 = vector.shape_cast %24 : vector<1x8xf32> to vector<1x1x8xf32>
    tpu.vector_store %arg4[%c0_16, %c0_17, %c0_18], %27 {strides = array<i32>} : memref<1x1x8xf32, #tpu.memory_space<vmem>>, vector<1x1x8xf32>,
    %28 = arith.mulf %18, %18 : vector<128x8xf32>
    %cst_19 = arith.constant dense<0.000000e+00> : vector<8xf32>
    %29 = vector.multi_reduction <add>, %28, %cst_19 [0] : vector<128x8xf32> to vector<8xf32>
    %30 = vector.shape_cast %29 : vector<8xf32> to vector<1x8xf32>
    %c0_20 = arith.constant 0 : index
    %c0_21 = arith.constant 0 : index
    %c0_22 = arith.constant 0 : index
    %31 = vector.load %arg5[%c0_20, %c0_21, %c0_22] : memref<1x1x8xf32, #tpu.memory_space<vmem>>, vector<1x1x8xf32>
    %32 = vector.shape_cast %31 : vector<1x1x8xf32> to vector<1x8xf32>
    %33 = vector.shape_cast %30 : vector<1x8xf32> to vector<1x1x8xf32>
    tpu.vector_store %arg5[%c0_20, %c0_21, %c0_22], %33 {strides = array<i32>} : memref<1x1x8xf32, #tpu.memory_space<vmem>>, vector<1x1x8xf32>,
    return
  }
  func.func @transform_0(%arg0: i32) -> (i32, i32, i32, i32) {
    %c0_i32 = arith.constant 0 : i32
    %c0_i32_0 = arith.constant 0 : i32
    %c0_i32_1 = arith.constant 0 : i32
    %c0_i32_2 = arith.constant 0 : i32
    return %arg0, %c0_i32, %c0_i32_0, %c0_i32_1 : i32, i32, i32, i32
  }
  func.func @transform_1(%arg0: i32) -> (i32, i32, i32) {
    %c0_i32 = arith.constant 0 : i32
    %c0_i32_0 = arith.constant 0 : i32
    %c0_i32_1 = arith.constant 0 : i32
    %c0_i32_2 = arith.constant 0 : i32
    return %c0_i32, %c0_i32_0, %c0_i32_1 : i32, i32, i32
  }
  func.func @transform_2(%arg0: i32) -> (i32, i32, i32) {
    %c0_i32 = arith.constant 0 : i32
    %c0_i32_0 = arith.constant 0 : i32
    %c0_i32_1 = arith.constant 0 : i32
    return %arg0, %c0_i32, %c0_i32_0 : i32, i32, i32
  }
  func.func @transform_3(%arg0: i32) -> (i32, i32, i32) {
    %c0_i32 = arith.constant 0 : i32
    %c0_i32_0 = arith.constant 0 : i32
    %c0_i32_1 = arith.constant 0 : i32
    return %arg0, %c0_i32, %c0_i32_0 : i32, i32, i32
  }
  func.func @transform_4(%arg0: i32) -> (i32, i32, i32) {
    %c0_i32 = arith.constant 0 : i32
    %c0_i32_0 = arith.constant 0 : i32
    %c0_i32_1 = arith.constant 0 : i32
    return %arg0, %c0_i32, %c0_i32_0 : i32, i32, i32
  }
}

module attributes {stable_mosaic.version = 11 : i64} {
  func.func @_bn_relu_kernel(%arg0: i32, %arg1: memref<32x128xbf16, #tpu.memory_space<vmem>>, %arg2: memref<1x128xf32, #tpu.memory_space<vmem>>, %arg3: memref<1x128xf32, #tpu.memory_space<vmem>>, %arg4: memref<32x128xf32, #tpu.memory_space<vmem>>) attributes {dimension_semantics = [#tpu.dimension_semantics<parallel>], iteration_bounds = array<i64: 1>, scalar_prefetch = 0 : i64, scratch_operands = 0 : i64, tpu.core_type = #tpu.core_type<tc>, window_params = [{transform_indices = @transform_0, window_bounds = array<i64: 32, 128>}, {pipeline_mode = #tpu.pipeline_mode<synchronous>, transform_indices = @transform_1, window_bounds = array<i64: 1, 128>}, {pipeline_mode = #tpu.pipeline_mode<synchronous>, transform_indices = @transform_2, window_bounds = array<i64: 1, 128>}, {transform_indices = @transform_3, window_bounds = array<i64: 32, 128>}]} {
    %c0 = arith.constant 0 : index
    %c0_0 = arith.constant 0 : index
    %0 = vector.load %arg1[%c0, %c0_0] : memref<32x128xbf16, #tpu.memory_space<vmem>>, vector<32x128xbf16>
    %1 = arith.extf %0 : vector<32x128xbf16> to vector<32x128xf32>
    %c0_1 = arith.constant 0 : index
    %c0_2 = arith.constant 0 : index
    %2 = vector.load %arg2[%c0_1, %c0_2] : memref<1x128xf32, #tpu.memory_space<vmem>>, vector<1x128xf32>
    %3 = vector.broadcast %2 : vector<1x128xf32> to vector<32x128xf32>
    %4 = arith.mulf %1, %3 : vector<32x128xf32>
    %c0_3 = arith.constant 0 : index
    %c0_4 = arith.constant 0 : index
    %5 = vector.load %arg3[%c0_3, %c0_4] : memref<1x128xf32, #tpu.memory_space<vmem>>, vector<1x128xf32>
    %6 = vector.broadcast %5 : vector<1x128xf32> to vector<32x128xf32>
    %7 = arith.addf %4, %6 : vector<32x128xf32>
    %cst = arith.constant 0.000000e+00 : f32
    %8 = vector.broadcast %cst : f32 to vector<32x128xf32>
    %9 = arith.maximumf %7, %8 : vector<32x128xf32>
    %c0_5 = arith.constant 0 : index
    %c0_6 = arith.constant 0 : index
    %10 = vector.load %arg4[%c0_5, %c0_6] : memref<32x128xf32, #tpu.memory_space<vmem>>, vector<32x128xf32>
    tpu.vector_store %arg4[%c0_5, %c0_6], %9 {strides = array<i32>} : memref<32x128xf32, #tpu.memory_space<vmem>>, vector<32x128xf32>,
    return
  }
  func.func @transform_0(%arg0: i32) -> (i32, i32) {
    %c0_i32 = arith.constant 0 : i32
    %c0_i32_0 = arith.constant 0 : i32
    return %arg0, %c0_i32 : i32, i32
  }
  func.func @transform_1(%arg0: i32) -> (i32, i32) {
    %c0_i32 = arith.constant 0 : i32
    %c0_i32_0 = arith.constant 0 : i32
    %c0_i32_1 = arith.constant 0 : i32
    return %c0_i32, %c0_i32_0 : i32, i32
  }
  func.func @transform_2(%arg0: i32) -> (i32, i32) {
    %c0_i32 = arith.constant 0 : i32
    %c0_i32_0 = arith.constant 0 : i32
    %c0_i32_1 = arith.constant 0 : i32
    return %c0_i32, %c0_i32_0 : i32, i32
  }
  func.func @transform_3(%arg0: i32) -> (i32, i32) {
    %c0_i32 = arith.constant 0 : i32
    %c0_i32_0 = arith.constant 0 : i32
    return %arg0, %c0_i32 : i32, i32
  }
}

</mosaic_0001>

<bundles_post_ra>
// kernel: tile.23
= control target key start
LH: loop header
LB: loop body
LE: loop exit
PB: predicated region body
PF: predicated region fallthrough
CT: control target
= control target key end

     0   :  { %s28_s0 = inlined_call_operand.vmem [shape: f32[8], index: 0, kind: input, shape index: {}]   ;;  %s29_s1 = inlined_call_operand.vmem [shape: f32[16,8], index: 1, kind: output, shape index: {}]  }
   0x1   :  { %v4_v0 = vld [vmem:[%s28_s0] ss:$0 sm:$0xff] }
   0x2   :  { %5 = vst [vmem:[%s29_s1] sm:$0xff] %v4_v0  ;;  %8 = vst [vmem:[%s29_s1 + $0x8] sm:$0xff] %v4_v0 }

// kernel: tile.24
= control target key start
LH: loop header
LB: loop body
LE: loop exit
PB: predicated region body
PF: predicated region fallthrough
CT: control target
= control target key end

     0   :  { %s131_s10 = smov 120   ;;  %s132_s11 = smov 104   ;;  %vm3_vm0 = vcmask 64512   ;;  %vm9_vm1 = vcmask 1048512   ;;  %vm15_vm2 = vcmask 982912   ;;  %vm21_vm3 = vcmask 917312   ;;  %s207_s0 = inlined_call_operand.vmem [shape: f32[16,8], index: 0, kind: input, shape index: {}]   ;;  %s208_s1 = inlined_call_operand.vmem [shape: f32[1,128], index: 1, kind: output, shape index: {}]  }
   0x1   :  { %v101_v0 = vld [vmem:[%s207_s0 + $0xf] sm:$0x1]   ;;  %v103_v1 = vld [vmem:[%s207_s0 + $0xd] sm:$0x1]   ;;  %v102_v2 = vld [vmem:[%s207_s0 + $0xe] sm:$0x1]  }
   0x2   :  { %7 = vrot.lane.b32.xlu0 %v101_v0, %s131_s10  ;;  %19 = vrot.lane.b32.xlu1 %v103_v1, %s132_s11  ;;  %v104_v3 = vld [vmem:[%s207_s0 + $0xc] sm:$0x1]   ;;  %s133_s16 = smov 112   ;;  %s134_s17 = smov 96   ;;  %v105_v4 = vld [vmem:[%s207_s0 + $0xb] sm:$0x1]  }
   0x3   :  { %v106_v5 = vld [vmem:[%s207_s0 + $0xa] sm:$0x1]   ;;  %v2_v6 = vld [vmem:[%s207_s0] sm:$0x1]   ;;  %s135_s24 = smov 88   ;;  %s136_s25 = smov 80  }
   0x4   :  { %4 = vst.msk [vmem:[#allocation0] sm:$0x1] %vm3_vm0, %v2_v6   ;;  %v107_v7 = vld [vmem:[%s207_s0 + $0x9] sm:$0x1]   ;;  %v108_v8 = vld [vmem:[%s207_s0 + $0x8] sm:$0x1]  }
   0x5   :  { %s137_s30 = smov 72   ;;  %s138_s2 = smov 64   ;;  %v109_v9 = vld [vmem:[%s207_s0 + $0x7] sm:$0x1]   ;;  %v110_v10 = vld [vmem:[%s207_s0 + $0x6] sm:$0x1]  }
   0x6   :  { %13 = vrot.lane.b32.xlu0 %v102_v2, %s133_s16  ;;  %25 = vrot.lane.b32.xlu1 %v104_v3, %s134_s17  ;;  %s139_s7 = smov 56   ;;  %s140_s8 = smov 48   ;;  %v111_v11 = vld [vmem:[%s207_s0 + $0x5] sm:$0x1]   ;;  %v112_v12 = vld [vmem:[%s207_s0 + $0x4] sm:$0x1]  }
   0x7   :  { %s141_s13 = smov 40   ;;  %s142_s14 = smov 32   ;;  %v113_v13 = vld [vmem:[%s207_s0 + $0x3] sm:$0x1]   ;;  %v114_v14 = vld [vmem:[%s207_s0 + $0x2] sm:$0x1]  }
   0x8   :  { %s143_s19 = smov 24   ;;  %s144_s20 = smov 16   ;;  %v115_v15 = vld [vmem:[%s207_s0 + $0x1] sm:$0x1]   ;;  %vm27_vm4 = vcmask 851712   ;;  %vm33_vm5 = vcmask 786112  }
   0x9   :  { %s145_s0 = smov 8   ;;  %vm39_vm6 = vcmask 720512   ;;  %vm45_vm7 = vcmask 654912   ;;  %vm51_vm8 = vcmask 589312   ;;  %vm57_vm9 = vcmask 523712  }
   0xa   :  { %31 = vrot.lane.b32.xlu0 %v105_v4, %s135_s24  ;;  %37 = vrot.lane.b32.xlu1 %v106_v5, %s136_s25  ;;  %vm63_vm10 = vcmask 458112   ;;  %vm69_vm11 = vcmask 392512   ;;  %vm75_vm12 = vcmask 326912   ;;  %vm81_vm13 = vcmask 261312  }
   0xb   :  { %vm87_vm14 = vcmask 195712   ;;  %vm93_vm15 = vcmask 130112  }
   0xe   :  { %43 = vrot.lane.b32.xlu0 %v107_v7, %s137_s30  ;;  %49 = vrot.lane.b32.xlu1 %v108_v8, %s138_s2 }
  0x12   :  { %55 = vrot.lane.b32.xlu0 %v109_v9, %s139_s7  ;;  %61 = vrot.lane.b32.xlu1 %v110_v10, %s140_s8 }
  0x16   :  { %67 = vrot.lane.b32.xlu0 %v111_v11, %s141_s13  ;;  %73 = vrot.lane.b32.xlu1 %v112_v12, %s142_s14 }
  0x1a   :  { %79 = vrot.lane.b32.xlu0 %v113_v13, %s143_s19  ;;  %85 = vrot.lane.b32.xlu1 %v114_v14, %s144_s20 }
  0x1e   :  { %91 = vrot.lane.b32.xlu0 %v115_v15, %s145_s0 }
  0x74   :  { %v8_v16 = vpop.permute.xlu0 %7   ;;  %v20_v17 = vpop.permute.xlu1 %19  }
  0x75   :  { %10 = vst.msk [vmem:[#allocation0] sm:$0x1] %vm9_vm1, %v8_v16  }
  0x78   :  { %v14_v18 = vpop.permute.xlu0 %13   ;;  %v26_v19 = vpop.permute.xlu1 %25  }
  0x79   :  { %16 = vst.msk [vmem:[#allocation0] sm:$0x1] %vm15_vm2, %v14_v18  }
  0x7a   :  { %22 = vst.msk [vmem:[#allocation0] sm:$0x1] %vm21_vm3, %v20_v17  }
  0x7b   :  { %28 = vst.msk [vmem:[#allocation0] sm:$0x1] %vm27_vm4, %v26_v19  }
  0x7c   :  { %v32_v20 = vpop.permute.xlu0 %31   ;;  %v38_v21 = vpop.permute.xlu1 %37  }
  0x7d   :  { %34 = vst.msk [vmem:[#allocation0] sm:$0x1] %vm33_vm5, %v32_v20  }
  0x7e   :  { %40 = vst.msk [vmem:[#allocation0] sm:$0x1] %vm39_vm6, %v38_v21  }
  0x80   :  { %v44_v22 = vpop.permute.xlu0 %43   ;;  %v50_v23 = vpop.permute.xlu1 %49  }
  0x81   :  { %46 = vst.msk [vmem:[#allocation0] sm:$0x1] %vm45_vm7, %v44_v22  }
  0x82   :  { %52 = vst.msk [vmem:[#allocation0] sm:$0x1] %vm51_vm8, %v50_v23  }
  0x84   :  { %v56_v24 = vpop.permute.xlu0 %55   ;;  %v62_v25 = vpop.permute.xlu1 %61  }
  0x85   :  { %58 = vst.msk [vmem:[#allocation0] sm:$0x1] %vm57_vm9, %v56_v24  }
  0x86   :  { %64 = vst.msk [vmem:[#allocation0] sm:$0x1] %vm63_vm10, %v62_v25  }
  0x88   :  { %v68_v26 = vpop.permute.xlu0 %67   ;;  %v74_v27 = vpop.permute.xlu1 %73  }
  0x89   :  { %70 = vst.msk [vmem:[#allocation0] sm:$0x1] %vm69_vm11, %v68_v26  }
  0x8a   :  { %76 = vst.msk [vmem:[#allocation0] sm:$0x1] %vm75_vm12, %v74_v27  }
  0x8c   :  { %v80_v28 = vpop.permute.xlu0 %79   ;;  %v86_v29 = vpop.permute.xlu1 %85  }
  0x8d   :  { %82 = vst.msk [vmem:[#allocation0] sm:$0x1] %vm81_vm13, %v80_v28  }
  0x8e   :  { %88 = vst.msk [vmem:[#allocation0] sm:$0x1] %vm87_vm14, %v86_v29  }
  0x90   :  { %v92_v30 = vpop.permute.xlu0 %91  }
  0x91   :  { %94 = vst.msk [vmem:[#allocation0] sm:$0x1] %vm93_vm15, %v92_v30  }
  0x98   :  { %v98_v31 = vld [vmem:[#allocation0] sm:$0x1] }
  0x99   :  { %100 = vst [vmem:[%s208_s1] sm:$0x1] %v98_v31 }

// kernel: conv_block_forward.5
= control target key start
LH: loop header
LB: loop body
LE: loop exit
PB: predicated region body
PF: predicated region fallthrough
CT: control target
= control target key end

     0   :  { %s140_s0 = inlined_call_operand.vmem [shape: bf16[32,128], index: 0, kind: input, shape index: {}]   ;;  %s141_s1 = inlined_call_operand.vmem [shape: f32[1,128], index: 1, kind: input, shape index: {}]   ;;  %s142_s2 = inlined_call_operand.vmem [shape: f32[1,128], index: 2, kind: input, shape index: {}]   ;;  %s143_s3 = inlined_call_operand.vmem [shape: bf16[32,128], index: 3, kind: output, shape index: {}]  }
   0x1   :  { %v83_v0 = vld [vmem:[%s140_s0] sm:$0xff]   ;;  %v100_v4 = vld [vmem:[%s140_s0 + $0x8] sm:$0xff]  }
   0x2   :  { %v72_v1 = vld [vmem:[%s141_s1] ss:$0 sm:$0xff]  ;;  %v84_v2 = vunpack.c.l.bf16 %v83_v0  ;;  %v85_v3 = vunpack.c.h.bf16 %v83_v0  ;;  %v88_v6 = vunpack.c.l.bf16 %v100_v4  ;;  %v89_v7 = vunpack.c.h.bf16 %v100_v4 }
   0x3   :  { %v73_v5 = vld [vmem:[%s142_s2] ss:$0 sm:$0xff] }
   0x4   :  { %v29_v8 = vmul.f32 %v84_v2, %v72_v1  ;;  %v30_v9 = vmul.f32 %v85_v3, %v72_v1  ;;  %v31_v10 = vmul.f32 %v88_v6, %v72_v1  ;;  %v32_v11 = vmul.f32 %v89_v7, %v72_v1 }
   0x6   :  { %v40_v12 = vadd.f32 %v73_v5, %v29_v8  ;;  %v41_v13 = vadd.f32 %v73_v5, %v30_v9  ;;  %v42_v14 = vadd.f32 %v73_v5, %v31_v10  ;;  %v43_v15 = vadd.f32 %v73_v5, %v32_v11 }
   0x8   :  { %v44_v16 = vmax.f32 %v40_v12, 0.0  ;;  %v45_v17 = vmax.f32 %v41_v13, 0.0  ;;  %v46_v18 = vmax.f32 %v42_v14, 0.0  ;;  %v47_v19 = vmax.f32 %v43_v15, 0.0 }
   0xa   :  { %v93_v20 = vpack.c.bf16 %v45_v17, %v44_v16  ;;  %v98_v21 = vpack.c.bf16 %v47_v19, %v46_v18 }
   0xc   :  { %94 = vst [vmem:[%s143_s3] sm:$0xff] %v93_v20   ;;  %101 = vst [vmem:[%s143_s3 + $0x8] sm:$0xff] %v98_v21  }

// kernel: conv_block_forward.4
= control target key start
LH: loop header
LB: loop body
LE: loop exit
PB: predicated region body
PF: predicated region fallthrough
CT: control target
= control target key end

     0   :  { %s1195_s15 = smov 0   ;;  %s1342_s0 = inlined_call_operand.vmem [shape: bf16[4,10,16,12], index: 0, kind: input, shape index: {}]   ;;  %s1343_s1 = inlined_call_operand.vmem [shape: bf16[3,12,8], index: 1, kind: input, shape index: {}]   ;;  %s1344_s2 = inlined_call_operand.vmem [shape: bf16[4,128,8], index: 2, kind: output, shape index: {0}]   ;;  %s1345_s3 = inlined_call_operand.vmem [shape: f32[4,1,8], index: 3, kind: output, shape index: {1}]   ;;  %s1346_s4 = inlined_call_operand.vmem [shape: f32[4,1,8], index: 4, kind: output, shape index: {2}]  }
   0x1 LB: > { %s937_s16 = sadd.s32 4294967295, %s1168_s15   ;;  %p941_p0 = scmp.ge.s32.totalorder %s1168_s15, 1  ;;  %s1168_s15 = sphi %s1195_s15, %s15_s15  }
   0x2   : > { %p167_p1 = scmp.lt.s32.totalorder %s1168_s15, 5 }
   0x4   : > { %p168_p2 = pnand %p941_p0, %p167_p1 }
   0x5   : > { %v1149_v0 = vld [vmem:[%s1343_s1 + $0x8] sm:$0x3f] (!%p168_p2)   ;;  %vm311_vm0 = vcmask (!%p168_p2), 1045504   ;;  %p199_p3 = scmp.lt.s32.totalorder (!%p168_p2), %s937_s16, 3  ;;  %v1150_v1 = vld [vmem:[%s1343_s1] sm:$0x3f] (!%p168_p2)  }
   0x6   : > { %171 = sbr.rel (%p168_p2) target bundleno = 298 (0x12a), region = 28  ;;  %1136 = vmatprep.subr.msk.bf16.mxu1 (!%p168_p2), %vm311_vm0, %v1149_v0  ;;  %v313_v2 = vsel (!%p168_p2), %vm311_vm0, %v1149_v0, 0  ;;  %v1153_v3 = vld [vmem:[%s1343_s1 + $0x10] sm:$0x3f] (!%p168_p2)   ;;  %1137 = vmatprep.subr.msk.bf16.mxu0 (!%p168_p2), %vm311_vm0, %v1150_v1  ;;  %v426_v4 = vsel (!%p168_p2), %vm311_vm0, %v1150_v1, 0  ;;  %vm286_vm1 = vcmask (!%p168_p2), 97280  }
   0x7   : > { %1049 = vmatpush3.bf16.msra.mxu1 (!%p168_p2), %v313_v2  ;;  %1067 = vmatpush3.bf16.msra.mxu0 (!%p168_p2), %v426_v4  ;;  %v542_v8 = vsel (!%p168_p2), %vm311_vm0, %v1153_v3, 0  ;;  %vm721_vm2 = vcmask (!%p168_p2), 60416   ;;  %vm738_vm3 = vcmask (!%p168_p2), 64512   ;;  %vm776_vm4 = vcmask (!%p168_p2), 57344  }
   0x8   : > { %1138 = vmatprep.subr.msk.bf16.mxu1 (!%p168_p2), %vm311_vm0, %v1150_v1  ;;  %1139 = vmatprep.subr.msk.bf16.mxu0 (!%p168_p2), %vm311_vm0, %v1153_v3 }
   0xd   : > { %s1348_s16 = smov (!%p199_p3, %s937_s16), 3 }
   0xe   : > { %s1140_s23 = smul.u32 80, %s1348_s16  ;;  %s1004_s27 = sshll.u32 %s1348_s16, 6 }
   0xf   : > { %s1265_s30 = scalar_lea.vmem %s1344_s2, %s1004_s27  ;;  %s211_s7 = scalar_lea.vmem %s1345_s3, %s1348_s16 }
  0x10   : > { %s1224_s26 = scalar_lea.vmem %s1342_s0, %s1140_s23  ;;  %s214_s10 = scalar_lea.vmem %s1346_s4, %s1348_s16 }
  0x11   : > { %v1151_v5 = vld [vmem:[%s1224_s26 + $0x8] sm:$0xff]   ;;  %v1152_v6 = vld [vmem:[%s1224_s26] sm:$0xff]   ;;  %v1154_v7 = vld [vmem:[%s1224_s26 + $0x10] sm:$0xff]  }
  0x12   : > { %1050 = vmatprep.mubr.msk.bf16.mxu1 %vm286_vm1, %v1151_v5  ;;  %1068 = vmatprep.mubr.msk.bf16.mxu0 %vm286_vm1, %v1152_v6  ;;  %v1155_v9 = vld [vmem:[%s1224_s26 + $0x18] sm:$0xff]   ;;  %v1156_v10 = vld [vmem:[%s1224_s26 + $0x20] sm:$0xff]   ;;  %v1157_v11 = vld [vmem:[%s1224_s26 + $0x28] sm:$0xff]  }
  0x13   : > { %1051 = vmatmul.mubr.msk.bf16.vlgmr.msra.gmra.mrb[0].mxu1 %vm286_vm1, %v1154_v7  ;;  %1069 = vmatmul.mubr.msk.bf16.vlgmr.msra.gmra.mrb[0].mxu0 %vm286_vm1, %v1151_v5  ;;  %v1158_v12 = vld [vmem:[%s1224_s26 + $0x30] sm:$0xff]   ;;  %v1159_v13 = vld [vmem:[%s1224_s26 + $0x38] sm:$0xff]   ;;  %v1160_v14 = vld [vmem:[%s1224_s26 + $0x40] sm:$0xff]  }
  0x14   : > { %1103 = vmatpush3.bf16.msra.mxu1 %v426_v4  ;;  %1085 = vmatpush3.bf16.msra.mxu0 %v542_v8  ;;  %v1161_v15 = vld [vmem:[%s1224_s26 + $0x48] sm:$0xff]  }
  0x15   : > { %1054 = vmatprep.mubr.msk.bf16.mxu1 %vm286_vm1, %v1155_v9  ;;  %1072 = vmatprep.mubr.msk.bf16.mxu0 %vm286_vm1, %v1154_v7 }
  0x1b   : > { %1055 = vmatmul.mubr.msk.bf16.gmra.mrb[4].mxu1 %vm286_vm1, %v1156_v10  ;;  %1073 = vmatmul.mubr.msk.bf16.gmra.mrb[4].mxu0 %vm286_vm1, %v1155_v9 }
  0x1c   : > { %1058 = vmatprep.mubr.msk.bf16.mxu1 %vm286_vm1, %v1157_v11  ;;  %1086 = vmatprep.mubr.msk.bf16.mxu0 %vm286_vm1, %v1154_v7 }
  0x23   : > { %1059 = vmatmul.mubr.msk.bf16.gmra.mrb[8].mxu1 %vm286_vm1, %v1158_v12  ;;  %1087 = vmatmul.mubr.msk.bf16.vlgmr.msra.gmra.mrb[0].mxu0 %vm286_vm1, %v1155_v9 }
  0x24   : > { %1062 = vmatprep.mubr.msk.bf16.mxu1 %vm286_vm1, %v1159_v13  ;;  %1090 = vmatprep.mubr.msk.bf16.mxu0 %vm286_vm1, %v1156_v10 }
  0x2b   : > { %1063 = vmatmul.mubr.msk.bf16.gmra.mrb[12].mxu1 %vm286_vm1, %v1160_v14  ;;  %1091 = vmatmul.mubr.msk.bf16.gmra.mrb[4].mxu0 %vm286_vm1, %v1157_v11 }
  0x2c   : > { %1076 = vmatprep.mubr.msk.bf16.mxu1 %vm286_vm1, %v1156_v10  ;;  %1094 = vmatprep.mubr.msk.bf16.mxu0 %vm286_vm1, %v1158_v12 }
  0x33   : > { %1077 = vmatmul.mubr.msk.bf16.vlgmr.msra.gmra.mrb[8].mxu1 %vm286_vm1, %v1157_v11  ;;  %1095 = vmatmul.mubr.msk.bf16.gmra.mrb[8].mxu0 %vm286_vm1, %v1159_v13 }
  0x34   : > { %1080 = vmatprep.mubr.msk.bf16.mxu1 %vm286_vm1, %v1158_v12  ;;  %1098 = vmatprep.mubr.msk.bf16.mxu0 %vm286_vm1, %v1160_v14 }
  0x3b   : > { %1081 = vmatmul.mubr.msk.bf16.gmra.mrb[12].mxu1 %vm286_vm1, %v1159_v13  ;;  %1099 = vmatmul.mubr.msk.bf16.gmra.mrb[12].mxu0 %vm286_vm1, %v1161_v15 }
  0xe6   : > { %v1052_v16 = vpop.f32.mrb[0].mxu1 }
  0xe7   : > { %v349_v17 = vpop.f32.mrb[1].mxu1 }
  0xe8   : > { %v1053_v18 = vpop.f32.mrb[2].mxu1 }
  0xe9   : > { %v352_v19 = vpop.f32.mrb[3].mxu1 }
  0xee   : > { %v1056_v20 = vpop.f32.mrb[4].mxu1 }
  0xef   : > { %v365_v21 = vpop.f32.mrb[5].mxu1 }
  0xf0   : > { %v1057_v22 = vpop.f32.mrb[6].mxu1 }
  0xf1   : > { %v368_v23 = vpop.f32.mrb[7].mxu1 }
  0xf6   : > { %v1088_v24 = vpop.f32.mrb[0].mxu0 }
  0xf7   : > { %v1104_v25 = vadd.f32 %v1088_v24, %v1052_v16  ;;  %v578_v26 = vpop.f32.mrb[1].mxu0 }
  0xf8   : > { %v1105_v27 = vadd.f32 %v578_v26, %v349_v17  ;;  %v1089_v28 = vpop.f32.mrb[2].mxu0 }
  0xf9   : > { %v1007_v29 = vpack.c.bf16 %v1104_v25, %v1104_v25  ;;  %v1106_v30 = vadd.f32 %v1089_v28, %v1053_v18  ;;  %v581_v31 = vpop.f32.mrb[3].mxu0  ;;  %v780_v35 = vmul.f32 %v1104_v25, %v1104_v25  ;;  %v742_v43 = vsel %vm738_vm3, %v1104_v25, 0.0 }
  0xfa   : > { %v1005_v32 = vpack.c.bf16 %v1105_v27, %v1105_v27  ;;  %v778_v33 = vmul.f32 %v1105_v27, %v1105_v27  ;;  %v1107_v34 = vadd.f32 %v581_v31, %v352_v19  ;;  %v739_v37 = vsel %vm738_vm3, %v1105_v27, 0.0 }
  0xfb   : > { %724 = vst.msk [vmem:[%s1265_s30 + $0x8] sm:$0xf] %vm721_vm2, %v1007_v29  ;;  %v1008_v36 = vpack.c.bf16 %v1106_v30, %v1106_v30  ;;  %v781_v41 = vmul.f32 %v1106_v30, %v1106_v30  ;;  %v797_v51 = vsel %vm738_vm3, %v780_v35, 0.0  ;;  %v744_v54 = vsel %vm738_vm3, %v1106_v30, 0.0 }
  0xfc   : > { %722 = vst.msk [vmem:[%s1265_s30] sm:$0xf] %vm721_vm2, %v1005_v32  ;;  %v1006_v38 = vpack.c.bf16 %v1107_v34, %v1107_v34  ;;  %v740_v39 = vsel %vm738_vm3, %v1107_v34, 0.0  ;;  %v779_v40 = vmul.f32 %v1107_v34, %v1107_v34  ;;  %v794_v44 = vsel %vm738_vm3, %v778_v33, 0.0 }
  0xfd   : > { %725 = vst.msk [vmem:[%s1265_s30 + $0xc] sm:$0xf] %vm721_vm2, %v1008_v36  ;;  %v741_v42 = vadd.f32 %v740_v39, %v739_v37  ;;  %v799_v55 = vsel %vm738_vm3, %v781_v41, 0.0 }
  0xfe   : > { %723 = vst.msk [vmem:[%s1265_s30 + $0x4] sm:$0xf] %vm721_vm2, %v1006_v38  ;;  %v795_v45 = vsel %vm738_vm3, %v779_v40, 0.0  ;;  %v1092_v46 = vpop.f32.mrb[4].mxu0 }
  0xff   : > { %v743_v47 = vadd.f32 %v742_v43, %v741_v42  ;;  %v796_v48 = vadd.f32 %v795_v45, %v794_v44  ;;  %v1108_v49 = vadd.f32 %v1092_v46, %v1056_v20  ;;  %v594_v50 = vpop.f32.mrb[5].mxu0 }
 0x100   : > { %v1109_v52 = vadd.f32 %v594_v50, %v365_v21  ;;  %v1093_v53 = vpop.f32.mrb[6].mxu0 }
 0x101   : > { %v798_v56 = vadd.f32 %v797_v51, %v796_v48  ;;  %v1011_v57 = vpack.c.bf16 %v1108_v49, %v1108_v49  ;;  %v597_v58 = vpop.f32.mrb[7].mxu0  ;;  %v745_v60 = vadd.f32 %v744_v54, %v743_v47  ;;  %v1110_v0 = vadd.f32 %v1093_v53, %v1057_v22 }
 0x102   : > { %v1009_v59 = vpack.c.bf16 %v1109_v52, %v1109_v52  ;;  %v746_v61 = vsel %vm738_vm3, %v1109_v52, 0.0  ;;  %v782_v62 = vmul.f32 %v1109_v52, %v1109_v52  ;;  %v1111_v1 = vadd.f32 %v597_v58, %v368_v23 }
 0x103   : > { %728 = vst.msk [vmem:[%s1265_s30 + $0x18] sm:$0xf] %vm721_vm2, %v1011_v57  ;;  %v800_v63 = vadd.f32 %v799_v55, %v798_v56  ;;  %v747_v2 = vadd.f32 %v746_v61, %v745_v60  ;;  %v784_v4 = vmul.f32 %v1108_v49, %v1108_v49  ;;  %v1012_v6 = vpack.c.bf16 %v1110_v0, %v1110_v0 }
 0x104   : > { %726 = vst.msk [vmem:[%s1265_s30 + $0x10] sm:$0xf] %vm721_vm2, %v1009_v59  ;;  %v801_v3 = vsel %vm738_vm3, %v782_v62, 0.0  ;;  %v1010_v7 = vpack.c.bf16 %v1111_v1, %v1111_v1  ;;  %v748_v8 = vsel %vm738_vm3, %v1111_v1, 0.0  ;;  %v783_v9 = vmul.f32 %v1111_v1, %v1111_v1 }
 0x105   : > { %v802_v5 = vadd.f32 %v801_v3, %v800_v63  ;;  %729 = vst.msk [vmem:[%s1265_s30 + $0x1c] sm:$0xf] %vm721_vm2, %v1012_v6  ;;  %v749_v12 = vadd.f32 %v748_v8, %v747_v2  ;;  %v750_v16 = vsel %vm738_vm3, %v1108_v49, 0.0  ;;  %v785_v17 = vmul.f32 %v1110_v0, %v1110_v0 }
 0x106   : > { %v1078_v10 = vpop.f32.mrb[8].mxu1  ;;  %v1096_v11 = vpop.f32.mrb[8].mxu0  ;;  %727 = vst.msk [vmem:[%s1265_s30 + $0x14] sm:$0xf] %vm721_vm2, %v1010_v7  ;;  %v803_v18 = vsel %vm738_vm3, %v783_v9, 0.0  ;;  %v805_v22 = vsel %vm738_vm3, %v784_v4, 0.0 }
 0x107   : > { %v1112_v13 = vadd.f32 %v1096_v11, %v1078_v10  ;;  %v494_v14 = vpop.f32.mrb[9].mxu1  ;;  %v610_v15 = vpop.f32.mrb[9].mxu0  ;;  %v751_v23 = vadd.f32 %v750_v16, %v749_v12  ;;  %v804_v24 = vadd.f32 %v803_v18, %v802_v5  ;;  %v752_v28 = vsel %vm738_vm3, %v1110_v0, 0.0 }
 0x108   : > { %v1113_v19 = vadd.f32 %v610_v15, %v494_v14  ;;  %v1079_v20 = vpop.f32.mrb[10].mxu1  ;;  %v1097_v21 = vpop.f32.mrb[10].mxu0  ;;  %v807_v36 = vsel %vm738_vm3, %v785_v17, 0.0 }
 0x109   : > { %v1015_v25 = vpack.c.bf16 %v1112_v13, %v1112_v13  ;;  %v497_v26 = vpop.f32.mrb[11].mxu1  ;;  %v613_v27 = vpop.f32.mrb[11].mxu0  ;;  %v806_v32 = vadd.f32 %v805_v22, %v804_v24  ;;  %v753_v33 = vadd.f32 %v752_v28, %v751_v23  ;;  %v1114_v34 = vadd.f32 %v1097_v21, %v1079_v20 }
 0x10a   : > { %v1013_v29 = vpack.c.bf16 %v1113_v19, %v1113_v19  ;;  %v754_v30 = vsel %vm738_vm3, %v1113_v19, 0.0  ;;  %v786_v31 = vmul.f32 %v1113_v19, %v1113_v19  ;;  %v1115_v35 = vadd.f32 %v613_v27, %v497_v26 }
 0x10b   : > { %732 = vst.msk [vmem:[%s1265_s30 + $0x28] sm:$0xf] %vm721_vm2, %v1015_v25  ;;  %v788_v38 = vmul.f32 %v1112_v13, %v1112_v13  ;;  %v755_v39 = vadd.f32 %v754_v30, %v753_v33  ;;  %v808_v40 = vadd.f32 %v807_v36, %v806_v32  ;;  %v1016_v41 = vpack.c.bf16 %v1114_v34, %v1114_v34 }
 0x10c   : > { %730 = vst.msk [vmem:[%s1265_s30 + $0x20] sm:$0xf] %vm721_vm2, %v1013_v29  ;;  %v809_v37 = vsel %vm738_vm3, %v786_v31, 0.0  ;;  %v1014_v42 = vpack.c.bf16 %v1115_v35, %v1115_v35  ;;  %v756_v43 = vsel %vm738_vm3, %v1115_v35, 0.0  ;;  %v787_v44 = vmul.f32 %v1115_v35, %v1115_v35 }
 0x10d   : > { %v810_v47 = vadd.f32 %v809_v37, %v808_v40  ;;  %733 = vst.msk [vmem:[%s1265_s30 + $0x2c] sm:$0xf] %vm721_vm2, %v1016_v41  ;;  %v757_v48 = vadd.f32 %v756_v43, %v755_v39  ;;  %v758_v52 = vsel %vm738_vm3, %v1112_v13, 0.0  ;;  %v789_v53 = vmul.f32 %v1114_v34, %v1114_v34 }
 0x10e   : > { %v1082_v45 = vpop.f32.mrb[12].mxu1  ;;  %v1100_v46 = vpop.f32.mrb[12].mxu0  ;;  %731 = vst.msk [vmem:[%s1265_s30 + $0x24] sm:$0xf] %vm721_vm2, %v1014_v42  ;;  %v811_v54 = vsel %vm738_vm3, %v787_v44, 0.0  ;;  %v813_v58 = vsel %vm738_vm3, %v788_v38, 0.0 }
 0x10f   : > { %v1116_v49 = vadd.f32 %v1100_v46, %v1082_v45  ;;  %v510_v50 = vpop.f32.mrb[13].mxu1  ;;  %v626_v51 = vpop.f32.mrb[13].mxu0  ;;  %v759_v59 = vadd.f32 %v758_v52, %v757_v48  ;;  %v812_v60 = vadd.f32 %v811_v54, %v810_v47  ;;  %v760_v0 = vsel %vm738_vm3, %v1114_v34, 0.0 }
 0x110   : > { %v1117_v55 = vadd.f32 %v626_v51, %v510_v50  ;;  %v1083_v56 = vpop.f32.mrb[14].mxu1  ;;  %v1101_v57 = vpop.f32.mrb[14].mxu0  ;;  %v815_v8 = vsel %vm738_vm3, %v789_v53, 0.0 }
 0x111   : > { %v1019_v61 = vpack.c.bf16 %v1116_v49, %v1116_v49  ;;  %v513_v62 = vpop.f32.mrb[15].mxu1  ;;  %v629_v63 = vpop.f32.mrb[15].mxu0  ;;  %v814_v4 = vadd.f32 %v813_v58, %v812_v60  ;;  %v761_v5 = vadd.f32 %v760_v0, %v759_v59  ;;  %v1118_v6 = vadd.f32 %v1101_v57, %v1083_v56 }
 0x112   : > { %v1017_v1 = vpack.c.bf16 %v1117_v55, %v1117_v55  ;;  %v762_v2 = vsel %vm738_vm3, %v1117_v55, 0.0  ;;  %v790_v3 = vmul.f32 %v1117_v55, %v1117_v55  ;;  %v1119_v7 = vadd.f32 %v629_v63, %v513_v62 }
 0x113   : > { %736 = vst.msk [vmem:[%s1265_s30 + $0x38] sm:$0xf] %vm721_vm2, %v1019_v61  ;;  %v763_v10 = vadd.f32 %v762_v2, %v761_v5  ;;  %v816_v11 = vadd.f32 %v815_v8, %v814_v4  ;;  %v1020_v12 = vpack.c.bf16 %v1118_v6, %v1118_v6  ;;  %v792_v13 = vmul.f32 %v1116_v49, %v1116_v49 }
 0x114   : > { %734 = vst.msk [vmem:[%s1265_s30 + $0x30] sm:$0xf] %vm721_vm2, %v1017_v1  ;;  %v817_v9 = vsel %vm738_vm3, %v790_v3, 0.0  ;;  %v1018_v14 = vpack.c.bf16 %v1119_v7, %v1119_v7  ;;  %v764_v15 = vsel %vm738_vm3, %v1119_v7, 0.0  ;;  %v791_v16 = vmul.f32 %v1119_v7, %v1119_v7 }
 0x115   : > { %v818_v17 = vadd.f32 %v817_v9, %v816_v11  ;;  %737 = vst.msk [vmem:[%s1265_s30 + $0x3c] sm:$0xf] %vm721_vm2, %v1020_v12  ;;  %v765_v18 = vadd.f32 %v764_v15, %v763_v10  ;;  %v766_v19 = vsel %vm738_vm3, %v1116_v49, 0.0  ;;  %v793_v20 = vmul.f32 %v1118_v6, %v1118_v6 }
 0x116   : > { %735 = vst.msk [vmem:[%s1265_s30 + $0x34] sm:$0xf] %vm721_vm2, %v1018_v14  ;;  %v819_v21 = vsel %vm738_vm3, %v791_v16, 0.0  ;;  %v821_v24 = vsel %vm738_vm3, %v792_v13, 0.0  ;;  %v768_v25 = vsel %vm738_vm3, %v1118_v6, 0.0 }
 0x117   : > { %v767_v22 = vadd.f32 %v766_v19, %v765_v18  ;;  %v820_v23 = vadd.f32 %v819_v21, %v818_v17  ;;  %v823_v28 = vsel %vm738_vm3, %v793_v20, 0.0 }
 0x119   : > { %v769_v26 = vadd.f32 %v768_v25, %v767_v22  ;;  %v822_v27 = vadd.f32 %v821_v24, %v820_v23 }
 0x11b   : > { %v770_v29 = vrot.slane %v769_v26, 4  ;;  %v824_v30 = vadd.f32 %v823_v28, %v822_v27 }
 0x11d   : > { %v771_v31 = vadd.f32 %v770_v29, %v769_v26  ;;  %v825_v32 = vrot.slane %v824_v30, 4 }
 0x11f   : > { %v772_v33 = vrot.slane %v771_v31, 2  ;;  %v826_v34 = vadd.f32 %v825_v32, %v824_v30 }
 0x121   : > { %v773_v35 = vadd.f32 %v772_v33, %v771_v31  ;;  %v827_v36 = vrot.slane %v826_v34, 2 }
 0x123   : > { %v774_v37 = vrot.slane %v773_v35, 1  ;;  %v828_v38 = vadd.f32 %v827_v36, %v826_v34 }
 0x125   : > { %v775_v39 = vadd.f32 %v774_v37, %v773_v35  ;;  %v829_v40 = vrot.slane %v828_v38, 1 }
 0x127   : > { %777 = vst.msk [vmem:[%s211_s7] sm:$0x1] %vm776_vm4, %v775_v39  ;;  %v830_v41 = vadd.f32 %v829_v40, %v828_v38 }
 0x129   : > { %831 = vst.msk [vmem:[%s214_s10] sm:$0x1] %vm776_vm4, %v830_v41 }
 0x12a PF: > { %s15_s15 = sadd.s32 1, %s1168_s15  }
 0x12b   : > { %p12_p4 = scmp.ge.s32.totalorder %s15_s15, 6  }
 0x12d   :  { %14 = sbr.rel (!%p12_p4) target bundleno = 1 (0x1), region = 84 }

// kernel: conv_block_forward.6
= control target key start
LH: loop header
LB: loop body
LE: loop exit
PB: predicated region body
PF: predicated region fallthrough
CT: control target
= control target key end

     0   :  { %s1229_s15 = smov 0   ;;  %s1385_s0 = inlined_call_operand.vmem [shape: bf16[4,10,16,24], index: 0, kind: input, shape index: {}]   ;;  %s1386_s1 = inlined_call_operand.vmem [shape: bf16[3,24,8], index: 1, kind: input, shape index: {}]   ;;  %s1387_s2 = inlined_call_operand.vmem [shape: bf16[4,128,8], index: 2, kind: output, shape index: {0}]   ;;  %s1388_s3 = inlined_call_operand.vmem [shape: f32[4,1,8], index: 3, kind: output, shape index: {1}]   ;;  %s1389_s4 = inlined_call_operand.vmem [shape: f32[4,1,8], index: 4, kind: output, shape index: {2}]  }
   0x1 LB: > { %s952_s16 = sadd.s32 4294967295, %s1202_s15   ;;  %p956_p0 = scmp.ge.s32.totalorder %s1202_s15, 1  ;;  %s1202_s15 = sphi %s1229_s15, %s15_s15  }
   0x2   : > { %p167_p1 = scmp.lt.s32.totalorder %s1202_s15, 5 }
   0x4   : > { %p168_p2 = pnand %p956_p0, %p167_p1 }
   0x5   : > { %v1180_v0 = vld [vmem:[%s1386_s1 + $0xc] sm:$0xff] (!%p168_p2)   ;;  %vm317_vm0 = vcmask (!%p168_p2), 1043456   ;;  %v1181_v1 = vld [vmem:[%s1386_s1] sm:$0xff] (!%p168_p2)   ;;  %p199_p3 = scmp.lt.s32.totalorder (!%p168_p2), %s952_s16, 3  ;;  %v1182_v2 = vld [vmem:[%s1386_s1 + $0x14] ss:$0 sps:$4 sm:$0xff] (!%p168_p2)  }
   0x6   : > { %171 = sbr.rel (%p168_p2) target bundleno = 298 (0x12a), region = 28  ;;  %1071 = vmatprep.subr.bf16.mxu1 (!%p168_p2), %v1180_v0  ;;  %1091 = vmatprep.subr.bf16.mxu0 (!%p168_p2), %v1181_v1  ;;  %v1183_v3 = vld [vmem:[%s1386_s1 + $0x8] ss:$0 sps:$4 sm:$0xff] (!%p168_p2)   ;;  %v319_v4 = vsel (!%p168_p2), %vm317_vm0, %v1182_v2, 0  ;;  %v1187_v6 = vld [vmem:[%s1386_s1 + $0x18] sm:$0xff] (!%p168_p2)   ;;  %vm292_vm1 = vcmask (!%p168_p2), 195584  }
   0x7   : > { %1072 = vmatpush3.bf16.msra.mxu1 (!%p168_p2), %v1180_v0  ;;  %1092 = vmatpush3.bf16.msra.mxu0 (!%p168_p2), %v1181_v1  ;;  %v436_v5 = vsel (!%p168_p2), %vm317_vm0, %v1183_v3, 0  ;;  %v1190_v8 = vld [vmem:[%s1386_s1 + $0x20] ss:$0 sps:$4 sm:$0xff] (!%p168_p2)   ;;  %vm736_vm2 = vcmask (!%p168_p2), 60416   ;;  %vm753_vm3 = vcmask (!%p168_p2), 64512   ;;  %vm791_vm4 = vcmask (!%p168_p2), 57344  }
   0x8   : > { %1167 = vmatprep.subr.msk.bf16.mxu1 (!%p168_p2), %vm317_vm0, %v1182_v2  ;;  %1168 = vmatprep.subr.msk.bf16.mxu0 (!%p168_p2), %vm317_vm0, %v1183_v3  ;;  %v557_v12 = vsel (!%p168_p2), %vm317_vm0, %v1190_v8, 0 }
   0xb   : > { %1074 = vmatpush3.bf16.msra.mxu1 (!%p168_p2), %v319_v4  ;;  %1094 = vmatpush3.bf16.msra.mxu0 (!%p168_p2), %v436_v5 }
   0xc   : > { %1131 = vmatprep.subr.bf16.mxu1 (!%p168_p2), %v1181_v1  ;;  %1111 = vmatprep.subr.bf16.mxu0 (!%p168_p2), %v1187_v6 }
   0xd   : > { %s1391_s16 = smov (!%p199_p3, %s952_s16), 3 }
   0xe   : > { %s1171_s25 = smul.u32 80, %s1391_s16  ;;  %s1024_s7 = sshll.u32 %s1391_s16, 6 }
   0xf   : > { %s1308_s10 = scalar_lea.vmem %s1387_s2, %s1024_s7  ;;  %s211_s13 = scalar_lea.vmem %s1388_s3, %s1391_s16 }
  0x10   : > { %s1262_s30 = scalar_lea.vmem %s1385_s0, %s1171_s25  ;;  %s214_s18 = scalar_lea.vmem %s1389_s4, %s1391_s16 }
  0x11   : > { %v1184_v7 = vld [vmem:[%s1262_s30 + $0x8] sm:$0xff]   ;;  %v1185_v9 = vld [vmem:[%s1262_s30] sm:$0xff]   ;;  %v1186_v10 = vld [vmem:[%s1262_s30 + $0x10] sm:$0xff]  }
  0x12   : > { %1075 = vmatprep.mubr.msk.bf16.mxu1 %vm292_vm1, %v1184_v7  ;;  %1095 = vmatprep.mubr.msk.bf16.mxu0 %vm292_vm1, %v1185_v9  ;;  %v1188_v11 = vld [vmem:[%s1262_s30 + $0x18] sm:$0xff]   ;;  %v1189_v13 = vld [vmem:[%s1262_s30 + $0x20] sm:$0xff]   ;;  %v1191_v14 = vld [vmem:[%s1262_s30 + $0x28] sm:$0xff]  }
  0x13   : > { %1076 = vmatmul.mubr.msk.bf16.vlgmr.msra.gmra.mrb[0].mxu1 %vm292_vm1, %v1186_v10  ;;  %1096 = vmatmul.mubr.msk.bf16.vlgmr.msra.gmra.mrb[0].mxu0 %vm292_vm1, %v1184_v7  ;;  %v1192_v15 = vld [vmem:[%s1262_s30 + $0x30] sm:$0xff]   ;;  %v1193_v16 = vld [vmem:[%s1262_s30 + $0x38] sm:$0xff]   ;;  %v1194_v17 = vld [vmem:[%s1262_s30 + $0x40] sm:$0xff]  }
  0x14   : > { %1133 = vmatpush3.bf16.msra.mxu1 %v1181_v1  ;;  %1112 = vmatpush3.bf16.msra.mxu0 %v1187_v6  ;;  %v1195_v18 = vld [vmem:[%s1262_s30 + $0x48] sm:$0xff]  }
  0x15   : > { %1079 = vmatprep.mubr.msk.bf16.mxu1 %vm292_vm1, %v1188_v11  ;;  %1099 = vmatprep.mubr.msk.bf16.mxu0 %vm292_vm1, %v1186_v10 }
  0x16   : > { %1170 = vmatprep.subr.msk.bf16.mxu0 %vm317_vm0, %v1190_v8  ;;  %1169 = vmatprep.subr.msk.bf16.mxu1 %vm317_vm0, %v1183_v3 }
  0x18   : > { %1114 = vmatpush3.bf16.msra.mxu0 %v557_v12  ;;  %1134 = vmatpush3.bf16.msra.mxu1 %v436_v5 }
  0x1b   : > { %1080 = vmatmul.mubr.msk.bf16.gmra.mrb[4].mxu1 %vm292_vm1, %v1189_v13  ;;  %1100 = vmatmul.mubr.msk.bf16.gmra.mrb[4].mxu0 %vm292_vm1, %v1188_v11 }
  0x1c   : > { %1083 = vmatprep.mubr.msk.bf16.mxu1 %vm292_vm1, %v1191_v14  ;;  %1115 = vmatprep.mubr.msk.bf16.mxu0 %vm292_vm1, %v1186_v10 }
  0x23   : > { %1084 = vmatmul.mubr.msk.bf16.gmra.mrb[8].mxu1 %vm292_vm1, %v1192_v15  ;;  %1116 = vmatmul.mubr.msk.bf16.vlgmr.msra.gmra.mrb[0].mxu0 %vm292_vm1, %v1188_v11 }
  0x24   : > { %1087 = vmatprep.mubr.msk.bf16.mxu1 %vm292_vm1, %v1193_v16  ;;  %1119 = vmatprep.mubr.msk.bf16.mxu0 %vm292_vm1, %v1189_v13 }
  0x2b   : > { %1088 = vmatmul.mubr.msk.bf16.gmra.mrb[12].mxu1 %vm292_vm1, %v1194_v17  ;;  %1120 = vmatmul.mubr.msk.bf16.gmra.mrb[4].mxu0 %vm292_vm1, %v1191_v14 }
  0x2c   : > { %1103 = vmatprep.mubr.msk.bf16.mxu1 %vm292_vm1, %v1189_v13  ;;  %1123 = vmatprep.mubr.msk.bf16.mxu0 %vm292_vm1, %v1192_v15 }
  0x33   : > { %1104 = vmatmul.mubr.msk.bf16.vlgmr.msra.gmra.mrb[8].mxu1 %vm292_vm1, %v1191_v14  ;;  %1124 = vmatmul.mubr.msk.bf16.gmra.mrb[8].mxu0 %vm292_vm1, %v1193_v16 }
  0x34   : > { %1107 = vmatprep.mubr.msk.bf16.mxu1 %vm292_vm1, %v1192_v15  ;;  %1127 = vmatprep.mubr.msk.bf16.mxu0 %vm292_vm1, %v1194_v17 }
  0x3b   : > { %1108 = vmatmul.mubr.msk.bf16.gmra.mrb[12].mxu1 %vm292_vm1, %v1193_v16  ;;  %1128 = vmatmul.mubr.msk.bf16.gmra.mrb[12].mxu0 %vm292_vm1, %v1195_v18 }
  0xe6   : > { %v1077_v19 = vpop.f32.mrb[0].mxu1 }
  0xe7   : > { %v355_v20 = vpop.f32.mrb[1].mxu1 }
  0xe8   : > { %v1078_v21 = vpop.f32.mrb[2].mxu1 }
  0xe9   : > { %v358_v22 = vpop.f32.mrb[3].mxu1 }
  0xee   : > { %v1081_v23 = vpop.f32.mrb[4].mxu1 }
  0xef   : > { %v371_v24 = vpop.f32.mrb[5].mxu1 }
  0xf0   : > { %v1082_v25 = vpop.f32.mrb[6].mxu1 }
  0xf1   : > { %v374_v26 = vpop.f32.mrb[7].mxu1 }
  0xf6   : > { %v1117_v27 = vpop.f32.mrb[0].mxu0 }
  0xf7   : > { %v1135_v28 = vadd.f32 %v1117_v27, %v1077_v19  ;;  %v593_v29 = vpop.f32.mrb[1].mxu0 }
  0xf8   : > { %v1136_v30 = vadd.f32 %v593_v29, %v355_v20  ;;  %v1118_v31 = vpop.f32.mrb[2].mxu0 }
  0xf9   : > { %v1027_v32 = vpack.c.bf16 %v1135_v28, %v1135_v28  ;;  %v1137_v33 = vadd.f32 %v1118_v31, %v1078_v21  ;;  %v596_v34 = vpop.f32.mrb[3].mxu0  ;;  %v795_v38 = vmul.f32 %v1135_v28, %v1135_v28  ;;  %v757_v46 = vsel %vm753_vm3, %v1135_v28, 0.0 }
  0xfa   : > { %v1025_v35 = vpack.c.bf16 %v1136_v30, %v1136_v30  ;;  %v793_v36 = vmul.f32 %v1136_v30, %v1136_v30  ;;  %v1138_v37 = vadd.f32 %v596_v34, %v358_v22  ;;  %v754_v40 = vsel %vm753_vm3, %v1136_v30, 0.0 }
  0xfb   : > { %739 = vst.msk [vmem:[%s1308_s10 + $0x8] sm:$0xf] %vm736_vm2, %v1027_v32  ;;  %v1028_v39 = vpack.c.bf16 %v1137_v33, %v1137_v33  ;;  %v796_v44 = vmul.f32 %v1137_v33, %v1137_v33  ;;  %v812_v54 = vsel %vm753_vm3, %v795_v38, 0.0  ;;  %v759_v57 = vsel %vm753_vm3, %v1137_v33, 0.0 }
  0xfc   : > { %737 = vst.msk [vmem:[%s1308_s10] sm:$0xf] %vm736_vm2, %v1025_v35  ;;  %v1026_v41 = vpack.c.bf16 %v1138_v37, %v1138_v37  ;;  %v755_v42 = vsel %vm753_vm3, %v1138_v37, 0.0  ;;  %v794_v43 = vmul.f32 %v1138_v37, %v1138_v37  ;;  %v809_v47 = vsel %vm753_vm3, %v793_v36, 0.0 }
  0xfd   : > { %740 = vst.msk [vmem:[%s1308_s10 + $0xc] sm:$0xf] %vm736_vm2, %v1028_v39  ;;  %v756_v45 = vadd.f32 %v755_v42, %v754_v40  ;;  %v814_v58 = vsel %vm753_vm3, %v796_v44, 0.0 }
  0xfe   : > { %738 = vst.msk [vmem:[%s1308_s10 + $0x4] sm:$0xf] %vm736_vm2, %v1026_v41  ;;  %v810_v48 = vsel %vm753_vm3, %v794_v43, 0.0  ;;  %v1121_v49 = vpop.f32.mrb[4].mxu0 }
  0xff   : > { %v758_v50 = vadd.f32 %v757_v46, %v756_v45  ;;  %v811_v51 = vadd.f32 %v810_v48, %v809_v47  ;;  %v1139_v52 = vadd.f32 %v1121_v49, %v1081_v23  ;;  %v609_v53 = vpop.f32.mrb[5].mxu0 }
 0x100   : > { %v1140_v55 = vadd.f32 %v609_v53, %v371_v24  ;;  %v1122_v56 = vpop.f32.mrb[6].mxu0 }
 0x101   : > { %v813_v59 = vadd.f32 %v812_v54, %v811_v51  ;;  %v1031_v60 = vpack.c.bf16 %v1139_v52, %v1139_v52  ;;  %v612_v61 = vpop.f32.mrb[7].mxu0  ;;  %v760_v63 = vadd.f32 %v759_v57, %v758_v50  ;;  %v1141_v3 = vadd.f32 %v1122_v56, %v1082_v25 }
 0x102   : > { %v1029_v62 = vpack.c.bf16 %v1140_v55, %v1140_v55  ;;  %v761_v0 = vsel %vm753_vm3, %v1140_v55, 0.0  ;;  %v797_v1 = vmul.f32 %v1140_v55, %v1140_v55  ;;  %v1142_v4 = vadd.f32 %v612_v61, %v374_v26 }
 0x103   : > { %743 = vst.msk [vmem:[%s1308_s10 + $0x18] sm:$0xf] %vm736_vm2, %v1031_v60  ;;  %v815_v2 = vadd.f32 %v814_v58, %v813_v59  ;;  %v762_v5 = vadd.f32 %v761_v0, %v760_v63  ;;  %v799_v7 = vmul.f32 %v1139_v52, %v1139_v52  ;;  %v1032_v9 = vpack.c.bf16 %v1141_v3, %v1141_v3 }
 0x104   : > { %741 = vst.msk [vmem:[%s1308_s10 + $0x10] sm:$0xf] %vm736_vm2, %v1029_v62  ;;  %v816_v6 = vsel %vm753_vm3, %v797_v1, 0.0  ;;  %v1030_v10 = vpack.c.bf16 %v1142_v4, %v1142_v4  ;;  %v763_v11 = vsel %vm753_vm3, %v1142_v4, 0.0  ;;  %v798_v12 = vmul.f32 %v1142_v4, %v1142_v4 }
 0x105   : > { %v817_v8 = vadd.f32 %v816_v6, %v815_v2  ;;  %744 = vst.msk [vmem:[%s1308_s10 + $0x1c] sm:$0xf] %vm736_vm2, %v1032_v9  ;;  %v764_v15 = vadd.f32 %v763_v11, %v762_v5  ;;  %v765_v19 = vsel %vm753_vm3, %v1139_v52, 0.0  ;;  %v800_v20 = vmul.f32 %v1141_v3, %v1141_v3 }
 0x106   : > { %v1105_v13 = vpop.f32.mrb[8].mxu1  ;;  %v1125_v14 = vpop.f32.mrb[8].mxu0  ;;  %742 = vst.msk [vmem:[%s1308_s10 + $0x14] sm:$0xf] %vm736_vm2, %v1030_v10  ;;  %v818_v21 = vsel %vm753_vm3, %v798_v12, 0.0  ;;  %v820_v25 = vsel %vm753_vm3, %v799_v7, 0.0 }
 0x107   : > { %v1143_v16 = vadd.f32 %v1125_v14, %v1105_v13  ;;  %v504_v17 = vpop.f32.mrb[9].mxu1  ;;  %v625_v18 = vpop.f32.mrb[9].mxu0  ;;  %v766_v26 = vadd.f32 %v765_v19, %v764_v15  ;;  %v819_v27 = vadd.f32 %v818_v21, %v817_v8  ;;  %v767_v31 = vsel %vm753_vm3, %v1141_v3, 0.0 }
 0x108   : > { %v1144_v22 = vadd.f32 %v625_v18, %v504_v17  ;;  %v1106_v23 = vpop.f32.mrb[10].mxu1  ;;  %v1126_v24 = vpop.f32.mrb[10].mxu0  ;;  %v822_v39 = vsel %vm753_vm3, %v800_v20, 0.0 }
 0x109   : > { %v1035_v28 = vpack.c.bf16 %v1143_v16, %v1143_v16  ;;  %v507_v29 = vpop.f32.mrb[11].mxu1  ;;  %v628_v30 = vpop.f32.mrb[11].mxu0  ;;  %v821_v35 = vadd.f32 %v820_v25, %v819_v27  ;;  %v768_v36 = vadd.f32 %v767_v31, %v766_v26  ;;  %v1145_v37 = vadd.f32 %v1126_v24, %v1106_v23 }
 0x10a   : > { %v1033_v32 = vpack.c.bf16 %v1144_v22, %v1144_v22  ;;  %v769_v33 = vsel %vm753_vm3, %v1144_v22, 0.0  ;;  %v801_v34 = vmul.f32 %v1144_v22, %v1144_v22  ;;  %v1146_v38 = vadd.f32 %v628_v30, %v507_v29 }
 0x10b   : > { %747 = vst.msk [vmem:[%s1308_s10 + $0x28] sm:$0xf] %vm736_vm2, %v1035_v28  ;;  %v803_v41 = vmul.f32 %v1143_v16, %v1143_v16  ;;  %v770_v42 = vadd.f32 %v769_v33, %v768_v36  ;;  %v823_v43 = vadd.f32 %v822_v39, %v821_v35  ;;  %v1036_v44 = vpack.c.bf16 %v1145_v37, %v1145_v37 }
 0x10c   : > { %745 = vst.msk [vmem:[%s1308_s10 + $0x20] sm:$0xf] %vm736_vm2, %v1033_v32  ;;  %v824_v40 = vsel %vm753_vm3, %v801_v34, 0.0  ;;  %v1034_v45 = vpack.c.bf16 %v1146_v38, %v1146_v38  ;;  %v771_v46 = vsel %vm753_vm3, %v1146_v38, 0.0  ;;  %v802_v47 = vmul.f32 %v1146_v38, %v1146_v38 }
 0x10d   : > { %v825_v50 = vadd.f32 %v824_v40, %v823_v43  ;;  %748 = vst.msk [vmem:[%s1308_s10 + $0x2c] sm:$0xf] %vm736_vm2, %v1036_v44  ;;  %v772_v51 = vadd.f32 %v771_v46, %v770_v42  ;;  %v773_v55 = vsel %vm753_vm3, %v1143_v16, 0.0  ;;  %v804_v56 = vmul.f32 %v1145_v37, %v1145_v37 }
 0x10e   : > { %v1109_v48 = vpop.f32.mrb[12].mxu1  ;;  %v1129_v49 = vpop.f32.mrb[12].mxu0  ;;  %746 = vst.msk [vmem:[%s1308_s10 + $0x24] sm:$0xf] %vm736_vm2, %v1034_v45  ;;  %v826_v57 = vsel %vm753_vm3, %v802_v47, 0.0  ;;  %v828_v61 = vsel %vm753_vm3, %v803_v41, 0.0 }
 0x10f   : > { %v1147_v52 = vadd.f32 %v1129_v49, %v1109_v48  ;;  %v520_v53 = vpop.f32.mrb[13].mxu1  ;;  %v641_v54 = vpop.f32.mrb[13].mxu0  ;;  %v774_v62 = vadd.f32 %v773_v55, %v772_v51  ;;  %v827_v63 = vadd.f32 %v826_v57, %v825_v50  ;;  %v775_v3 = vsel %vm753_vm3, %v1145_v37, 0.0 }
 0x110   : > { %v1148_v58 = vadd.f32 %v641_v54, %v520_v53  ;;  %v1110_v59 = vpop.f32.mrb[14].mxu1  ;;  %v1130_v60 = vpop.f32.mrb[14].mxu0  ;;  %v830_v11 = vsel %vm753_vm3, %v804_v56, 0.0 }
 0x111   : > { %v1039_v0 = vpack.c.bf16 %v1147_v52, %v1147_v52  ;;  %v523_v1 = vpop.f32.mrb[15].mxu1  ;;  %v644_v2 = vpop.f32.mrb[15].mxu0  ;;  %v829_v7 = vadd.f32 %v828_v61, %v827_v63  ;;  %v776_v8 = vadd.f32 %v775_v3, %v774_v62  ;;  %v1149_v9 = vadd.f32 %v1130_v60, %v1110_v59 }
 0x112   : > { %v1037_v4 = vpack.c.bf16 %v1148_v58, %v1148_v58  ;;  %v777_v5 = vsel %vm753_vm3, %v1148_v58, 0.0  ;;  %v805_v6 = vmul.f32 %v1148_v58, %v1148_v58  ;;  %v1150_v10 = vadd.f32 %v644_v2, %v523_v1 }
 0x113   : > { %751 = vst.msk [vmem:[%s1308_s10 + $0x38] sm:$0xf] %vm736_vm2, %v1039_v0  ;;  %v778_v13 = vadd.f32 %v777_v5, %v776_v8  ;;  %v831_v14 = vadd.f32 %v830_v11, %v829_v7  ;;  %v1040_v15 = vpack.c.bf16 %v1149_v9, %v1149_v9  ;;  %v807_v16 = vmul.f32 %v1147_v52, %v1147_v52 }
 0x114   : > { %749 = vst.msk [vmem:[%s1308_s10 + $0x30] sm:$0xf] %vm736_vm2, %v1037_v4  ;;  %v832_v12 = vsel %vm753_vm3, %v805_v6, 0.0  ;;  %v1038_v17 = vpack.c.bf16 %v1150_v10, %v1150_v10  ;;  %v779_v18 = vsel %vm753_vm3, %v1150_v10, 0.0  ;;  %v806_v19 = vmul.f32 %v1150_v10, %v1150_v10 }
 0x115   : > { %v833_v20 = vadd.f32 %v832_v12, %v831_v14  ;;  %752 = vst.msk [vmem:[%s1308_s10 + $0x3c] sm:$0xf] %vm736_vm2, %v1040_v15  ;;  %v780_v21 = vadd.f32 %v779_v18, %v778_v13  ;;  %v781_v22 = vsel %vm753_vm3, %v1147_v52, 0.0  ;;  %v808_v23 = vmul.f32 %v1149_v9, %v1149_v9 }
 0x116   : > { %750 = vst.msk [vmem:[%s1308_s10 + $0x34] sm:$0xf] %vm736_vm2, %v1038_v17  ;;  %v834_v24 = vsel %vm753_vm3, %v806_v19, 0.0  ;;  %v836_v27 = vsel %vm753_vm3, %v807_v16, 0.0  ;;  %v783_v28 = vsel %vm753_vm3, %v1149_v9, 0.0 }
 0x117   : > { %v782_v25 = vadd.f32 %v781_v22, %v780_v21  ;;  %v835_v26 = vadd.f32 %v834_v24, %v833_v20  ;;  %v838_v31 = vsel %vm753_vm3, %v808_v23, 0.0 }
 0x119   : > { %v784_v29 = vadd.f32 %v783_v28, %v782_v25  ;;  %v837_v30 = vadd.f32 %v836_v27, %v835_v26 }
 0x11b   : > { %v785_v32 = vrot.slane %v784_v29, 4  ;;  %v839_v33 = vadd.f32 %v838_v31, %v837_v30 }
 0x11d   : > { %v786_v34 = vadd.f32 %v785_v32, %v784_v29  ;;  %v840_v35 = vrot.slane %v839_v33, 4 }
 0x11f   : > { %v787_v36 = vrot.slane %v786_v34, 2  ;;  %v841_v37 = vadd.f32 %v840_v35, %v839_v33 }
 0x121   : > { %v788_v38 = vadd.f32 %v787_v36, %v786_v34  ;;  %v842_v39 = vrot.slane %v841_v37, 2 }
 0x123   : > { %v789_v40 = vrot.slane %v788_v38, 1  ;;  %v843_v41 = vadd.f32 %v842_v39, %v841_v37 }
 0x125   : > { %v790_v42 = vadd.f32 %v789_v40, %v788_v38  ;;  %v844_v43 = vrot.slane %v843_v41, 1 }
 0x127   : > { %792 = vst.msk [vmem:[%s211_s13] sm:$0x1] %vm791_vm4, %v790_v42  ;;  %v845_v44 = vadd.f32 %v844_v43, %v843_v41 }
 0x129   : > { %846 = vst.msk [vmem:[%s214_s18] sm:$0x1] %vm791_vm4, %v845_v44 }
 0x12a PF: > { %s15_s15 = sadd.s32 1, %s1202_s15  }
 0x12b   : > { %p12_p4 = scmp.ge.s32.totalorder %s15_s15, 6  }
 0x12d   :  { %14 = sbr.rel (!%p12_p4) target bundleno = 1 (0x1), region = 84 }

// kernel: conv_block_forward.7
= control target key start
LH: loop header
LB: loop body
LE: loop exit
PB: predicated region body
PF: predicated region fallthrough
CT: control target
= control target key end

     0   :  { %s111_s0 = inlined_call_operand.vmem [shape: bf16[32,128], index: 0, kind: input, shape index: {}]   ;;  %s112_s1 = inlined_call_operand.vmem [shape: f32[1,128], index: 1, kind: input, shape index: {}]   ;;  %s113_s2 = inlined_call_operand.vmem [shape: f32[1,128], index: 2, kind: input, shape index: {}]   ;;  %s114_s3 = inlined_call_operand.vmem [shape: f32[32,128], index: 3, kind: output, shape index: {}]  }
   0x1   :  { %v59_v0 = vld [vmem:[%s111_s0] sm:$0xff]   ;;  %v66_v4 = vld [vmem:[%s111_s0 + $0x8] sm:$0xff]  }
   0x2   :  { %v56_v1 = vld [vmem:[%s112_s1] ss:$0 sm:$0xff]  ;;  %v60_v2 = vunpack.c.l.bf16 %v59_v0  ;;  %v61_v3 = vunpack.c.h.bf16 %v59_v0  ;;  %v64_v6 = vunpack.c.l.bf16 %v66_v4  ;;  %v65_v7 = vunpack.c.h.bf16 %v66_v4 }
   0x3   :  { %v57_v5 = vld [vmem:[%s113_s2] ss:$0 sm:$0xff] }
   0x4   :  { %v29_v8 = vmul.f32 %v60_v2, %v56_v1  ;;  %v30_v9 = vmul.f32 %v61_v3, %v56_v1  ;;  %v31_v10 = vmul.f32 %v64_v6, %v56_v1  ;;  %v32_v11 = vmul.f32 %v65_v7, %v56_v1 }
   0x6   :  { %v40_v12 = vadd.f32 %v57_v5, %v29_v8  ;;  %v41_v13 = vadd.f32 %v57_v5, %v30_v9  ;;  %v42_v14 = vadd.f32 %v57_v5, %v31_v10  ;;  %v43_v15 = vadd.f32 %v57_v5, %v32_v11 }
   0x8   :  { %v44_v16 = vmax.f32 %v40_v12, 0.0  ;;  %v45_v17 = vmax.f32 %v41_v13, 0.0  ;;  %v46_v18 = vmax.f32 %v42_v14, 0.0  ;;  %v47_v19 = vmax.f32 %v43_v15, 0.0 }
   0xa   :  { %48 = vst [vmem:[%s114_s3] sm:$0xff] %v44_v16  ;;  %49 = vst [vmem:[%s114_s3 + $0x8] sm:$0xff] %v45_v17 }
   0xb   :  { %50 = vst [vmem:[%s114_s3 + $0x10] sm:$0xff] %v46_v18  ;;  %51 = vst [vmem:[%s114_s3 + $0x18] sm:$0xff] %v47_v19 }

</bundles_post_ra>
